<compile_context>
chip_gen: v7x
topology: tpu7x:2x2x1
jax: 0.10.0
libtpu: 0.0.40
codegen_flags: <defaults>
</compile_context>

<pallas_src>
import functools

import jax
import jax.numpy as jnp
import numpy as np
from jax.experimental import pallas as pl
from jax.experimental.pallas import tpu as pltpu


def _round_up(x, m):
    return ((x + m - 1) // m) * m


# ---------------------------------------------------------------------------
# Fused Pallas kernel: conv GEMM + pool + bias/ReLU + fc1 + ReLU + fc2
# ---------------------------------------------------------------------------
def _make_fused_kernel(P, Bp, Cout):
    def kernel(xq_ref, wgd_ref, bc_ref, w1_ref, b1_ref, w2_ref, b2_ref,
               o_ref, fc1_in_ref):
        # --- conv as ONE 128-lane GEMM; lane groups = the four 2x2-pool quadrants ---
        y = jnp.dot(xq_ref[...], wgd_ref[...],
                    preferred_element_type=jnp.float32)                 # (P*Bp, 4*Cout)

        # --- 2x2 max-pool == elementwise max over the four Cout-lane groups ---
        m = jnp.maximum(jnp.maximum(y[:, 0:Cout], y[:, Cout:2 * Cout]),
                        jnp.maximum(y[:, 2 * Cout:3 * Cout], y[:, 3 * Cout:4 * Cout]))

        # --- bias + ReLU applied ONCE after the max (shared bias, monotone ReLU) ---
        pooled = jnp.maximum(m + bc_ref[...], 0.0)                      # (P*Bp, Cout)

        # --- relayout: rows (p, b) -> rows b / lanes (p, c), so fc1 is ONE GEMM ---
        # 49 static, sublane-aligned (Bp, Cout) copies into lane offsets p*Cout.
        for p in range(P):
            fc1_in_ref[:, p * Cout:(p + 1) * Cout] = pooled[p * Bp:(p + 1) * Bp, :]

        # --- fc1: single (Bp, F) x (F, Nh) K-streamed GEMM + ReLU ---
        h = jnp.dot(fc1_in_ref[...], w1_ref[...],
                    preferred_element_type=jnp.float32) + b1_ref[...]
        h = jnp.maximum(h, 0.0)                                         # (Bp, Nh)

        # --- fc2 (tiny); write the full padded block, wrapper drops padding rows ---
        o_ref[...] = jnp.dot(h, w2_ref[...],
                             preferred_element_type=jnp.float32) + b2_ref[...]

    return kernel


# ---------------------------------------------------------------------------
# One-time weight preparation (hoisted OUT of the per-call path)
# ---------------------------------------------------------------------------
def prepare_params(w_conv, b_conv, w_fc1, b_fc1, w_fc2, b_fc2,
                   image_height, image_width):
    Cout, Cin, KH, KW = w_conv.shape
    Hp, Wp = (image_height - KH + 1) // 2, (image_width - KW + 1) // 2
    P = Hp * Wp
    K = KH * KW * Cin
    Kp = _round_up(K, 8)                       # 27 -> 32  (so 4*Kp = 128 lanes)
    Nh = w_fc1.shape[0]
    Nout = w_fc2.shape[0]

    # conv weight (Cout, Cin, KH, KW) -> GEMM matrix (Kp, Cout), rows ordered (kh, kw, cin)
    wg = jnp.transpose(w_conv, (2, 3, 1, 0)).reshape(K, Cout)
    wg = jnp.pad(wg, ((0, Kp - K), (0, 0)))
    # block-diagonal RHS: wg repeated once per pooling quadrant -> (4*Kp, 4*Cout) = (128, 128)
    wgd = jnp.zeros((4 * Kp, 4 * Cout), jnp.float32)
    for q in range(4):
        wgd = wgd.at[q * Kp:(q + 1) * Kp, q * Cout:(q + 1) * Cout].set(wg)

    bc = b_conv.reshape(1, Cout).astype(jnp.float32)

    # fc1 weight: torch NCHW-flatten column index c*P + p  ->  kernel lane index p*Cout + c
    w1k = jnp.transpose(w_fc1.reshape(Nh, Cout, Hp, Wp), (2, 3, 1, 0)).reshape(P * Cout, Nh)
    b1k = b_fc1.reshape(1, Nh).astype(jnp.float32)
    w2k = jnp.transpose(w_fc2).astype(jnp.float32)        # (Nh, Nout)
    b2k = b_fc2.reshape(1, Nout).astype(jnp.float32)

    return (wgd.astype(jnp.float32), bc, w1k.astype(jnp.float32), b1k, w2k, b2k)


# ---------------------------------------------------------------------------
# Forward pass: thin gather-based im2col wrapper + one pallas_call
# ---------------------------------------------------------------------------
@functools.partial(jax.jit, static_argnames=("KH", "KW"))
def step1_forward(image, wgd, bc, w1k, b1k, w2k, b2k, *, KH=3, KW=3):
    """image: (B, 3, H, W) float32 (PyTorch NCHW)."""
    B, Cin, H, W = image.shape
    Cout = bc.shape[1]
    Kp = wgd.shape[0] // 4
    Nout = b2k.shape[1]
    Ho, Wo = H - KH + 1, W - KW + 1
    Hp, Wp = Ho // 2, Wo // 2
    P = Hp * Wp
    F = P * Cout
    K = KH * KW * Cin
    Bp = _round_up(B, 8)
    assert w1k.shape[0] == F

    # --- quadrant im2col with ONE gather (no 36-slice loop) -------------------------
    x = jnp.transpose(image, (0, 2, 3, 1))                       # NHWC (B, H, W, Cin)
    hh = (2 * jnp.arange(Hp)[:, None, None]
          + jnp.arange(2)[None, :, None]
          + jnp.arange(KH)[None, None, :])                       # (Hp, 2, KH): 2*hp + dh + kh
    ww = (2 * jnp.arange(Wp)[:, None, None]
          + jnp.arange(2)[None, :, None]
          + jnp.arange(KW)[None, None, :])                       # (Wp, 2, KW): 2*wp + dw + kw
    xg = x[:, hh]                                                # (B, Hp, 2, KH, W, Cin)
    xg = xg[:, :, :, :, ww, :]                                   # (B, Hp, 2, KH, Wp, 2, KW, Cin)
    xg = jnp.transpose(xg, (1, 4, 0, 2, 5, 3, 6, 7))             # (Hp, Wp, B, dh, dw, KH, KW, Cin)
    xg = xg.reshape(P, B, 4, K)                                  # rows (p, b); cols (q, k)
    xg = jnp.pad(xg, ((0, 0), (0, Bp - B), (0, 0), (0, Kp - K)))
    xq = xg.reshape(P * Bp, 4 * Kp)                              # (392, 128)

    kernel = _make_fused_kernel(P, Bp, Cout)
    vmem = pl.BlockSpec(memory_space=pltpu.MemorySpace.VMEM)
    out = pl.pallas_call(
        kernel,
        out_shape=jax.ShapeDtypeStruct((Bp, Nout), jnp.float32),
        in_specs=[vmem] * 7,
        out_specs=vmem,
        scratch_shapes=[pltpu.VMEM((Bp, F), jnp.float32)],       # fc1 input relayout buffer
    )(xq, wgd, bc, w1k, b1k, w2k, b2k)
    return out[:B]                                               # drop batch-padding rows


# ---------------------------------------------------------------------------
# Pure-JAX reference reproducing PyTorch forward semantics (verification)
# ---------------------------------------------------------------------------
def step1_reference(image, w_conv, b_conv, w_fc1, b_fc1, w_fc2, b_fc2):
    y = jax.lax.conv_general_dilated(
        image, w_conv, window_strides=(1, 1), padding="VALID",
        dimension_numbers=("NCHW", "OIHW", "NCHW"))
    y = jnp.maximum(y + b_conv.reshape(1, -1, 1, 1), 0.0)
    y = jax.lax.reduce_window(y, -jnp.inf, jax.lax.max,
                              window_dimensions=(1, 1, 2, 2),
                              window_strides=(1, 1, 2, 2), padding="VALID")
    y = y.reshape(y.shape[0], -1)                                # NCHW flatten
    h = jnp.maximum(y @ w_fc1.T + b_fc1, 0.0)
    return h @ w_fc2.T + b_fc2


# ---------------------------------------------------------------------------
# Main
# ---------------------------------------------------------------------------
if __name__ == "__main__":
    B, Cin, H, W = 2, 3, 16, 16
    Cout = 32
    Hp, Wp = (H - 2) // 2, (W - 2) // 2
    F = Cout * Hp * Wp                                           # 32 * 7 * 7 = 1568

    key = jax.random.PRNGKey(0)
    ks = jax.random.split(key, 7)
    image  = jax.random.normal(ks[0], (B, Cin, H, W), jnp.float32)
    w_conv = jax.random.normal(ks[1], (Cout, Cin, 3, 3), jnp.float32) * 0.1
    b_conv = jax.random.normal(ks[2], (Cout,), jnp.float32) * 0.1
    w_fc1  = jax.random.normal(ks[3], (64, F), jnp.float32) * 0.02
    b_fc1  = jax.random.normal(ks[4], (64,), jnp.float32) * 0.02
    w_fc2  = jax.random.normal(ks[5], (6, 64), jnp.float32) * 0.1
    b_fc2  = jax.random.normal(ks[6], (6,), jnp.float32) * 0.1

    # One-time weight layout prep (NOT in the per-call path).
    prepped = prepare_params(w_conv, b_conv, w_fc1, b_fc1, w_fc2, b_fc2, H, W)
    prepped = jax.block_until_ready(prepped)

    out = step1_forward(image, *prepped)
    out = jax.block_until_ready(out)

    ref = step1_reference(image, w_conv, b_conv, w_fc1, b_fc1, w_fc2, b_fc2)
    np.testing.assert_allclose(np.asarray(out), np.asarray(ref), rtol=2e-4, atol=2e-4)

    assert out.shape == (B, 6)
    print("KERNEL_OK")
</pallas_src>

<mosaic_0001>
module attributes {stable_mosaic.version = 11 : i64} {
  func.func @kernel(%arg0: memref<392x128xf32, #tpu.memory_space<vmem>>, %arg1: memref<128x128xf32, #tpu.memory_space<vmem>>, %arg2: memref<1x32xf32, #tpu.memory_space<vmem>>, %arg3: memref<1568x64xf32, #tpu.memory_space<vmem>>, %arg4: memref<1x64xf32, #tpu.memory_space<vmem>>, %arg5: memref<64x6xf32, #tpu.memory_space<vmem>>, %arg6: memref<1x6xf32, #tpu.memory_space<vmem>>, %arg7: memref<8x6xf32, #tpu.memory_space<vmem>>, %arg8: memref<8x1568xf32, #tpu.memory_space<vmem>>) attributes {dimension_semantics = [], scalar_prefetch = 0 : i64, scratch_operands = 1 : i64, tpu.core_type = #tpu.core_type<tc>} {
    %c0 = arith.constant 0 : index
    %c0_0 = arith.constant 0 : index
    %0 = vector.load %arg0[%c0, %c0_0] : memref<392x128xf32, #tpu.memory_space<vmem>>, vector<392x128xf32>
    %c0_1 = arith.constant 0 : index
    %c0_2 = arith.constant 0 : index
    %1 = vector.load %arg1[%c0_1, %c0_2] : memref<128x128xf32, #tpu.memory_space<vmem>>, vector<128x128xf32>
    %cst = arith.constant dense<0.000000e+00> : vector<392x128xf32>
    %2 = tpu.matmul %0, %1, %cst {dimension_numbers = #tpu.dot_dimension_numbers<[1], [0], [0], [1], [0, 0, 1, 1], [], []>} : vector<392x128xf32>, vector<128x128xf32>, vector<392x128xf32> -> vector<392x128xf32>
    %3 = vector.extract_strided_slice %2 {offsets = [0, 0], sizes = [392, 32], strides = [1, 1]} : vector<392x128xf32> to vector<392x32xf32>
    %4 = vector.extract_strided_slice %2 {offsets = [0, 32], sizes = [392, 32], strides = [1, 1]} : vector<392x128xf32> to vector<392x32xf32>
    %5 = arith.maximumf %3, %4 : vector<392x32xf32>
    %6 = vector.extract_strided_slice %2 {offsets = [0, 64], sizes = [392, 32], strides = [1, 1]} : vector<392x128xf32> to vector<392x32xf32>
    %7 = vector.extract_strided_slice %2 {offsets = [0, 96], sizes = [392, 32], strides = [1, 1]} : vector<392x128xf32> to vector<392x32xf32>
    %8 = arith.maximumf %6, %7 : vector<392x32xf32>
    %9 = arith.maximumf %5, %8 : vector<392x32xf32>
    %c0_3 = arith.constant 0 : index
    %c0_4 = arith.constant 0 : index
    %10 = vector.load %arg2[%c0_3, %c0_4] : memref<1x32xf32, #tpu.memory_space<vmem>>, vector<1x32xf32>
    %11 = vector.broadcast %10 : vector<1x32xf32> to vector<392x32xf32>
    %12 = arith.addf %9, %11 : vector<392x32xf32>
    %cst_5 = arith.constant 0.000000e+00 : f32
    %13 = vector.broadcast %cst_5 : f32 to vector<392x32xf32>
    %14 = arith.maximumf %12, %13 : vector<392x32xf32>
    %15 = vector.extract_strided_slice %14 {offsets = [0, 0], sizes = [8, 32], strides = [1, 1]} : vector<392x32xf32> to vector<8x32xf32>
    %c0_6 = arith.constant 0 : index
    %c0_7 = arith.constant 0 : index
    %16 = vector.load %arg8[%c0_6, %c0_7] : memref<8x1568xf32, #tpu.memory_space<vmem>>, vector<8x32xf32>
    tpu.vector_store %arg8[%c0_6, %c0_7], %15 {strides = array<i32>} : memref<8x1568xf32, #tpu.memory_space<vmem>>, vector<8x32xf32>,
    %17 = vector.extract_strided_slice %14 {offsets = [8, 0], sizes = [8, 32], strides = [1, 1]} : vector<392x32xf32> to vector<8x32xf32>
    %c0_8 = arith.constant 0 : index
    %c32 = arith.constant 32 : index
    %18 = vector.load %arg8[%c0_8, %c32] : memref<8x1568xf32, #tpu.memory_space<vmem>>, vector<8x32xf32>
    tpu.vector_store %arg8[%c0_8, %c32], %17 {strides = array<i32>} : memref<8x1568xf32, #tpu.memory_space<vmem>>, vector<8x32xf32>,
    %19 = vector.extract_strided_slice %14 {offsets = [16, 0], sizes = [8, 32], strides = [1, 1]} : vector<392x32xf32> to vector<8x32xf32>
    %c0_9 = arith.constant 0 : index
    %c64 = arith.constant 64 : index
    %20 = vector.load %arg8[%c0_9, %c64] : memref<8x1568xf32, #tpu.memory_space<vmem>>, vector<8x32xf32>
    tpu.vector_store %arg8[%c0_9, %c64], %19 {strides = array<i32>} : memref<8x1568xf32, #tpu.memory_space<vmem>>, vector<8x32xf32>,
    %21 = vector.extract_strided_slice %14 {offsets = [24, 0], sizes = [8, 32], strides = [1, 1]} : vector<392x32xf32> to vector<8x32xf32>
    %c0_10 = arith.constant 0 : index
    %c96 = arith.constant 96 : index
    %22 = vector.load %arg8[%c0_10, %c96] : memref<8x1568xf32, #tpu.memory_space<vmem>>, vector<8x32xf32>
    tpu.vector_store %arg8[%c0_10, %c96], %21 {strides = array<i32>} : memref<8x1568xf32, #tpu.memory_space<vmem>>, vector<8x32xf32>,
    %23 = vector.extract_strided_slice %14 {offsets = [32, 0], sizes = [8, 32], strides = [1, 1]} : vector<392x32xf32> to vector<8x32xf32>
    %c0_11 = arith.constant 0 : index
    %c128 = arith.constant 128 : index
    %24 = vector.load %arg8[%c0_11, %c128] : memref<8x1568xf32, #tpu.memory_space<vmem>>, vector<8x32xf32>
    tpu.vector_store %arg8[%c0_11, %c128], %23 {strides = array<i32>} : memref<8x1568xf32, #tpu.memory_space<vmem>>, vector<8x32xf32>,
    %25 = vector.extract_strided_slice %14 {offsets = [40, 0], sizes = [8, 32], strides = [1, 1]} : vector<392x32xf32> to vector<8x32xf32>
    %c0_12 = arith.constant 0 : index
    %c160 = arith.constant 160 : index
    %26 = vector.load %arg8[%c0_12, %c160] : memref<8x1568xf32, #tpu.memory_space<vmem>>, vector<8x32xf32>
    tpu.vector_store %arg8[%c0_12, %c160], %25 {strides = array<i32>} : memref<8x1568xf32, #tpu.memory_space<vmem>>, vector<8x32xf32>,
    %27 = vector.extract_strided_slice %14 {offsets = [48, 0], sizes = [8, 32], strides = [1, 1]} : vector<392x32xf32> to vector<8x32xf32>
    %c0_13 = arith.constant 0 : index
    %c192 = arith.constant 192 : index
    %28 = vector.load %arg8[%c0_13, %c192] : memref<8x1568xf32, #tpu.memory_space<vmem>>, vector<8x32xf32>
    tpu.vector_store %arg8[%c0_13, %c192], %27 {strides = array<i32>} : memref<8x1568xf32, #tpu.memory_space<vmem>>, vector<8x32xf32>,
    %29 = vector.extract_strided_slice %14 {offsets = [56, 0], sizes = [8, 32], strides = [1, 1]} : vector<392x32xf32> to vector<8x32xf32>
    %c0_14 = arith.constant 0 : index
    %c224 = arith.constant 224 : index
    %30 = vector.load %arg8[%c0_14, %c224] : memref<8x1568xf32, #tpu.memory_space<vmem>>, vector<8x32xf32>
    tpu.vector_store %arg8[%c0_14, %c224], %29 {strides = array<i32>} : memref<8x1568xf32, #tpu.memory_space<vmem>>, vector<8x32xf32>,
    %31 = vector.extract_strided_slice %14 {offsets = [64, 0], sizes = [8, 32], strides = [1, 1]} : vector<392x32xf32> to vector<8x32xf32>
    %c0_15 = arith.constant 0 : index
    %c256 = arith.constant 256 : index
    %32 = vector.load %arg8[%c0_15, %c256] : memref<8x1568xf32, #tpu.memory_space<vmem>>, vector<8x32xf32>
    tpu.vector_store %arg8[%c0_15, %c256], %31 {strides = array<i32>} : memref<8x1568xf32, #tpu.memory_space<vmem>>, vector<8x32xf32>,
    %33 = vector.extract_strided_slice %14 {offsets = [72, 0], sizes = [8, 32], strides = [1, 1]} : vector<392x32xf32> to vector<8x32xf32>
    %c0_16 = arith.constant 0 : index
    %c288 = arith.constant 288 : index
    %34 = vector.load %arg8[%c0_16, %c288] : memref<8x1568xf32, #tpu.memory_space<vmem>>, vector<8x32xf32>
    tpu.vector_store %arg8[%c0_16, %c288], %33 {strides = array<i32>} : memref<8x1568xf32, #tpu.memory_space<vmem>>, vector<8x32xf32>,
    %35 = vector.extract_strided_slice %14 {offsets = [80, 0], sizes = [8, 32], strides = [1, 1]} : vector<392x32xf32> to vector<8x32xf32>
    %c0_17 = arith.constant 0 : index
    %c320 = arith.constant 320 : index
    %36 = vector.load %arg8[%c0_17, %c320] : memref<8x1568xf32, #tpu.memory_space<vmem>>, vector<8x32xf32>
    tpu.vector_store %arg8[%c0_17, %c320], %35 {strides = array<i32>} : memref<8x1568xf32, #tpu.memory_space<vmem>>, vector<8x32xf32>,
    %37 = vector.extract_strided_slice %14 {offsets = [88, 0], sizes = [8, 32], strides = [1, 1]} : vector<392x32xf32> to vector<8x32xf32>
    %c0_18 = arith.constant 0 : index
    %c352 = arith.constant 352 : index
    %38 = vector.load %arg8[%c0_18, %c352] : memref<8x1568xf32, #tpu.memory_space<vmem>>, vector<8x32xf32>
    tpu.vector_store %arg8[%c0_18, %c352], %37 {strides = array<i32>} : memref<8x1568xf32, #tpu.memory_space<vmem>>, vector<8x32xf32>,
    %39 = vector.extract_strided_slice %14 {offsets = [96, 0], sizes = [8, 32], strides = [1, 1]} : vector<392x32xf32> to vector<8x32xf32>
    %c0_19 = arith.constant 0 : index
    %c384 = arith.constant 384 : index
    %40 = vector.load %arg8[%c0_19, %c384] : memref<8x1568xf32, #tpu.memory_space<vmem>>, vector<8x32xf32>
    tpu.vector_store %arg8[%c0_19, %c384], %39 {strides = array<i32>} : memref<8x1568xf32, #tpu.memory_space<vmem>>, vector<8x32xf32>,
    %41 = vector.extract_strided_slice %14 {offsets = [104, 0], sizes = [8, 32], strides = [1, 1]} : vector<392x32xf32> to vector<8x32xf32>
    %c0_20 = arith.constant 0 : index
    %c416 = arith.constant 416 : index
    %42 = vector.load %arg8[%c0_20, %c416] : memref<8x1568xf32, #tpu.memory_space<vmem>>, vector<8x32xf32>
    tpu.vector_store %arg8[%c0_20, %c416], %41 {strides = array<i32>} : memref<8x1568xf32, #tpu.memory_space<vmem>>, vector<8x32xf32>,
    %43 = vector.extract_strided_slice %14 {offsets = [112, 0], sizes = [8, 32], strides = [1, 1]} : vector<392x32xf32> to vector<8x32xf32>
    %c0_21 = arith.constant 0 : index
    %c448 = arith.constant 448 : index
    %44 = vector.load %arg8[%c0_21, %c448] : memref<8x1568xf32, #tpu.memory_space<vmem>>, vector<8x32xf32>
    tpu.vector_store %arg8[%c0_21, %c448], %43 {strides = array<i32>} : memref<8x1568xf32, #tpu.memory_space<vmem>>, vector<8x32xf32>,
    %45 = vector.extract_strided_slice %14 {offsets = [120, 0], sizes = [8, 32], strides = [1, 1]} : vector<392x32xf32> to vector<8x32xf32>
    %c0_22 = arith.constant 0 : index
    %c480 = arith.constant 480 : index
    %46 = vector.load %arg8[%c0_22, %c480] : memref<8x1568xf32, #tpu.memory_space<vmem>>, vector<8x32xf32>
    tpu.vector_store %arg8[%c0_22, %c480], %45 {strides = array<i32>} : memref<8x1568xf32, #tpu.memory_space<vmem>>, vector<8x32xf32>,
    %47 = vector.extract_strided_slice %14 {offsets = [128, 0], sizes = [8, 32], strides = [1, 1]} : vector<392x32xf32> to vector<8x32xf32>
    %c0_23 = arith.constant 0 : index
    %c512 = arith.constant 512 : index
    %48 = vector.load %arg8[%c0_23, %c512] : memref<8x1568xf32, #tpu.memory_space<vmem>>, vector<8x32xf32>
    tpu.vector_store %arg8[%c0_23, %c512], %47 {strides = array<i32>} : memref<8x1568xf32, #tpu.memory_space<vmem>>, vector<8x32xf32>,
    %49 = vector.extract_strided_slice %14 {offsets = [136, 0], sizes = [8, 32], strides = [1, 1]} : vector<392x32xf32> to vector<8x32xf32>
    %c0_24 = arith.constant 0 : index
    %c544 = arith.constant 544 : index
    %50 = vector.load %arg8[%c0_24, %c544] : memref<8x1568xf32, #tpu.memory_space<vmem>>, vector<8x32xf32>
    tpu.vector_store %arg8[%c0_24, %c544], %49 {strides = array<i32>} : memref<8x1568xf32, #tpu.memory_space<vmem>>, vector<8x32xf32>,
    %51 = vector.extract_strided_slice %14 {offsets = [144, 0], sizes = [8, 32], strides = [1, 1]} : vector<392x32xf32> to vector<8x32xf32>
    %c0_25 = arith.constant 0 : index
    %c576 = arith.constant 576 : index
    %52 = vector.load %arg8[%c0_25, %c576] : memref<8x1568xf32, #tpu.memory_space<vmem>>, vector<8x32xf32>
    tpu.vector_store %arg8[%c0_25, %c576], %51 {strides = array<i32>} : memref<8x1568xf32, #tpu.memory_space<vmem>>, vector<8x32xf32>,
    %53 = vector.extract_strided_slice %14 {offsets = [152, 0], sizes = [8, 32], strides = [1, 1]} : vector<392x32xf32> to vector<8x32xf32>
    %c0_26 = arith.constant 0 : index
    %c608 = arith.constant 608 : index
    %54 = vector.load %arg8[%c0_26, %c608] : memref<8x1568xf32, #tpu.memory_space<vmem>>, vector<8x32xf32>
    tpu.vector_store %arg8[%c0_26, %c608], %53 {strides = array<i32>} : memref<8x1568xf32, #tpu.memory_space<vmem>>, vector<8x32xf32>,
    %55 = vector.extract_strided_slice %14 {offsets = [160, 0], sizes = [8, 32], strides = [1, 1]} : vector<392x32xf32> to vector<8x32xf32>
    %c0_27 = arith.constant 0 : index
    %c640 = arith.constant 640 : index
    %56 = vector.load %arg8[%c0_27, %c640] : memref<8x1568xf32, #tpu.memory_space<vmem>>, vector<8x32xf32>
    tpu.vector_store %arg8[%c0_27, %c640], %55 {strides = array<i32>} : memref<8x1568xf32, #tpu.memory_space<vmem>>, vector<8x32xf32>,
    %57 = vector.extract_strided_slice %14 {offsets = [168, 0], sizes = [8, 32], strides = [1, 1]} : vector<392x32xf32> to vector<8x32xf32>
    %c0_28 = arith.constant 0 : index
    %c672 = arith.constant 672 : index
    %58 = vector.load %arg8[%c0_28, %c672] : memref<8x1568xf32, #tpu.memory_space<vmem>>, vector<8x32xf32>
    tpu.vector_store %arg8[%c0_28, %c672], %57 {strides = array<i32>} : memref<8x1568xf32, #tpu.memory_space<vmem>>, vector<8x32xf32>,
    %59 = vector.extract_strided_slice %14 {offsets = [176, 0], sizes = [8, 32], strides = [1, 1]} : vector<392x32xf32> to vector<8x32xf32>
    %c0_29 = arith.constant 0 : index
    %c704 = arith.constant 704 : index
    %60 = vector.load %arg8[%c0_29, %c704] : memref<8x1568xf32, #tpu.memory_space<vmem>>, vector<8x32xf32>
    tpu.vector_store %arg8[%c0_29, %c704], %59 {strides = array<i32>} : memref<8x1568xf32, #tpu.memory_space<vmem>>, vector<8x32xf32>,
    %61 = vector.extract_strided_slice %14 {offsets = [184, 0], sizes = [8, 32], strides = [1, 1]} : vector<392x32xf32> to vector<8x32xf32>
    %c0_30 = arith.constant 0 : index
    %c736 = arith.constant 736 : index
    %62 = vector.load %arg8[%c0_30, %c736] : memref<8x1568xf32, #tpu.memory_space<vmem>>, vector<8x32xf32>
    tpu.vector_store %arg8[%c0_30, %c736], %61 {strides = array<i32>} : memref<8x1568xf32, #tpu.memory_space<vmem>>, vector<8x32xf32>,
    %63 = vector.extract_strided_slice %14 {offsets = [192, 0], sizes = [8, 32], strides = [1, 1]} : vector<392x32xf32> to vector<8x32xf32>
    %c0_31 = arith.constant 0 : index
    %c768 = arith.constant 768 : index
    %64 = vector.load %arg8[%c0_31, %c768] : memref<8x1568xf32, #tpu.memory_space<vmem>>, vector<8x32xf32>
    tpu.vector_store %arg8[%c0_31, %c768], %63 {strides = array<i32>} : memref<8x1568xf32, #tpu.memory_space<vmem>>, vector<8x32xf32>,
    %65 = vector.extract_strided_slice %14 {offsets = [200, 0], sizes = [8, 32], strides = [1, 1]} : vector<392x32xf32> to vector<8x32xf32>
    %c0_32 = arith.constant 0 : index
    %c800 = arith.constant 800 : index
    %66 = vector.load %arg8[%c0_32, %c800] : memref<8x1568xf32, #tpu.memory_space<vmem>>, vector<8x32xf32>
    tpu.vector_store %arg8[%c0_32, %c800], %65 {strides = array<i32>} : memref<8x1568xf32, #tpu.memory_space<vmem>>, vector<8x32xf32>,
    %67 = vector.extract_strided_slice %14 {offsets = [208, 0], sizes = [8, 32], strides = [1, 1]} : vector<392x32xf32> to vector<8x32xf32>
    %c0_33 = arith.constant 0 : index
    %c832 = arith.constant 832 : index
    %68 = vector.load %arg8[%c0_33, %c832] : memref<8x1568xf32, #tpu.memory_space<vmem>>, vector<8x32xf32>
    tpu.vector_store %arg8[%c0_33, %c832], %67 {strides = array<i32>} : memref<8x1568xf32, #tpu.memory_space<vmem>>, vector<8x32xf32>,
    %69 = vector.extract_strided_slice %14 {offsets = [216, 0], sizes = [8, 32], strides = [1, 1]} : vector<392x32xf32> to vector<8x32xf32>
    %c0_34 = arith.constant 0 : index
    %c864 = arith.constant 864 : index
    %70 = vector.load %arg8[%c0_34, %c864] : memref<8x1568xf32, #tpu.memory_space<vmem>>, vector<8x32xf32>
    tpu.vector_store %arg8[%c0_34, %c864], %69 {strides = array<i32>} : memref<8x1568xf32, #tpu.memory_space<vmem>>, vector<8x32xf32>,
    %71 = vector.extract_strided_slice %14 {offsets = [224, 0], sizes = [8, 32], strides = [1, 1]} : vector<392x32xf32> to vector<8x32xf32>
    %c0_35 = arith.constant 0 : index
    %c896 = arith.constant 896 : index
    %72 = vector.load %arg8[%c0_35, %c896] : memref<8x1568xf32, #tpu.memory_space<vmem>>, vector<8x32xf32>
    tpu.vector_store %arg8[%c0_35, %c896], %71 {strides = array<i32>} : memref<8x1568xf32, #tpu.memory_space<vmem>>, vector<8x32xf32>,
    %73 = vector.extract_strided_slice %14 {offsets = [232, 0], sizes = [8, 32], strides = [1, 1]} : vector<392x32xf32> to vector<8x32xf32>
    %c0_36 = arith.constant 0 : index
    %c928 = arith.constant 928 : index
    %74 = vector.load %arg8[%c0_36, %c928] : memref<8x1568xf32, #tpu.memory_space<vmem>>, vector<8x32xf32>
    tpu.vector_store %arg8[%c0_36, %c928], %73 {strides = array<i32>} : memref<8x1568xf32, #tpu.memory_space<vmem>>, vector<8x32xf32>,
    %75 = vector.extract_strided_slice %14 {offsets = [240, 0], sizes = [8, 32], strides = [1, 1]} : vector<392x32xf32> to vector<8x32xf32>
    %c0_37 = arith.constant 0 : index
    %c960 = arith.constant 960 : index
    %76 = vector.load %arg8[%c0_37, %c960] : memref<8x1568xf32, #tpu.memory_space<vmem>>, vector<8x32xf32>
    tpu.vector_store %arg8[%c0_37, %c960], %75 {strides = array<i32>} : memref<8x1568xf32, #tpu.memory_space<vmem>>, vector<8x32xf32>,
    %77 = vector.extract_strided_slice %14 {offsets = [248, 0], sizes = [8, 32], strides = [1, 1]} : vector<392x32xf32> to vector<8x32xf32>
    %c0_38 = arith.constant 0 : index
    %c992 = arith.constant 992 : index
    %78 = vector.load %arg8[%c0_38, %c992] : memref<8x1568xf32, #tpu.memory_space<vmem>>, vector<8x32xf32>
    tpu.vector_store %arg8[%c0_38, %c992], %77 {strides = array<i32>} : memref<8x1568xf32, #tpu.memory_space<vmem>>, vector<8x32xf32>,
    %79 = vector.extract_strided_slice %14 {offsets = [256, 0], sizes = [8, 32], strides = [1, 1]} : vector<392x32xf32> to vector<8x32xf32>
    %c0_39 = arith.constant 0 : index
    %c1024 = arith.constant 1024 : index
    %80 = vector.load %arg8[%c0_39, %c1024] : memref<8x1568xf32, #tpu.memory_space<vmem>>, vector<8x32xf32>
    tpu.vector_store %arg8[%c0_39, %c1024], %79 {strides = array<i32>} : memref<8x1568xf32, #tpu.memory_space<vmem>>, vector<8x32xf32>,
    %81 = vector.extract_strided_slice %14 {offsets = [264, 0], sizes = [8, 32], strides = [1, 1]} : vector<392x32xf32> to vector<8x32xf32>
    %c0_40 = arith.constant 0 : index
    %c1056 = arith.constant 1056 : index
    %82 = vector.load %arg8[%c0_40, %c1056] : memref<8x1568xf32, #tpu.memory_space<vmem>>, vector<8x32xf32>
    tpu.vector_store %arg8[%c0_40, %c1056], %81 {strides = array<i32>} : memref<8x1568xf32, #tpu.memory_space<vmem>>, vector<8x32xf32>,
    %83 = vector.extract_strided_slice %14 {offsets = [272, 0], sizes = [8, 32], strides = [1, 1]} : vector<392x32xf32> to vector<8x32xf32>
    %c0_41 = arith.constant 0 : index
    %c1088 = arith.constant 1088 : index
    %84 = vector.load %arg8[%c0_41, %c1088] : memref<8x1568xf32, #tpu.memory_space<vmem>>, vector<8x32xf32>
    tpu.vector_store %arg8[%c0_41, %c1088], %83 {strides = array<i32>} : memref<8x1568xf32, #tpu.memory_space<vmem>>, vector<8x32xf32>,
    %85 = vector.extract_strided_slice %14 {offsets = [280, 0], sizes = [8, 32], strides = [1, 1]} : vector<392x32xf32> to vector<8x32xf32>
    %c0_42 = arith.constant 0 : index
    %c1120 = arith.constant 1120 : index
    %86 = vector.load %arg8[%c0_42, %c1120] : memref<8x1568xf32, #tpu.memory_space<vmem>>, vector<8x32xf32>
    tpu.vector_store %arg8[%c0_42, %c1120], %85 {strides = array<i32>} : memref<8x1568xf32, #tpu.memory_space<vmem>>, vector<8x32xf32>,
    %87 = vector.extract_strided_slice %14 {offsets = [288, 0], sizes = [8, 32], strides = [1, 1]} : vector<392x32xf32> to vector<8x32xf32>
    %c0_43 = arith.constant 0 : index
    %c1152 = arith.constant 1152 : index
    %88 = vector.load %arg8[%c0_43, %c1152] : memref<8x1568xf32, #tpu.memory_space<vmem>>, vector<8x32xf32>
    tpu.vector_store %arg8[%c0_43, %c1152], %87 {strides = array<i32>} : memref<8x1568xf32, #tpu.memory_space<vmem>>, vector<8x32xf32>,
    %89 = vector.extract_strided_slice %14 {offsets = [296, 0], sizes = [8, 32], strides = [1, 1]} : vector<392x32xf32> to vector<8x32xf32>
    %c0_44 = arith.constant 0 : index
    %c1184 = arith.constant 1184 : index
    %90 = vector.load %arg8[%c0_44, %c1184] : memref<8x1568xf32, #tpu.memory_space<vmem>>, vector<8x32xf32>
    tpu.vector_store %arg8[%c0_44, %c1184], %89 {strides = array<i32>} : memref<8x1568xf32, #tpu.memory_space<vmem>>, vector<8x32xf32>,
    %91 = vector.extract_strided_slice %14 {offsets = [304, 0], sizes = [8, 32], strides = [1, 1]} : vector<392x32xf32> to vector<8x32xf32>
    %c0_45 = arith.constant 0 : index
    %c1216 = arith.constant 1216 : index
    %92 = vector.load %arg8[%c0_45, %c1216] : memref<8x1568xf32, #tpu.memory_space<vmem>>, vector<8x32xf32>
    tpu.vector_store %arg8[%c0_45, %c1216], %91 {strides = array<i32>} : memref<8x1568xf32, #tpu.memory_space<vmem>>, vector<8x32xf32>,
    %93 = vector.extract_strided_slice %14 {offsets = [312, 0], sizes = [8, 32], strides = [1, 1]} : vector<392x32xf32> to vector<8x32xf32>
    %c0_46 = arith.constant 0 : index
    %c1248 = arith.constant 1248 : index
    %94 = vector.load %arg8[%c0_46, %c1248] : memref<8x1568xf32, #tpu.memory_space<vmem>>, vector<8x32xf32>
    tpu.vector_store %arg8[%c0_46, %c1248], %93 {strides = array<i32>} : memref<8x1568xf32, #tpu.memory_space<vmem>>, vector<8x32xf32>,
    %95 = vector.extract_strided_slice %14 {offsets = [320, 0], sizes = [8, 32], strides = [1, 1]} : vector<392x32xf32> to vector<8x32xf32>
    %c0_47 = arith.constant 0 : index
    %c1280 = arith.constant 1280 : index
    %96 = vector.load %arg8[%c0_47, %c1280] : memref<8x1568xf32, #tpu.memory_space<vmem>>, vector<8x32xf32>
    tpu.vector_store %arg8[%c0_47, %c1280], %95 {strides = array<i32>} : memref<8x1568xf32, #tpu.memory_space<vmem>>, vector<8x32xf32>,
    %97 = vector.extract_strided_slice %14 {offsets = [328, 0], sizes = [8, 32], strides = [1, 1]} : vector<392x32xf32> to vector<8x32xf32>
    %c0_48 = arith.constant 0 : index
    %c1312 = arith.constant 1312 : index
    %98 = vector.load %arg8[%c0_48, %c1312] : memref<8x1568xf32, #tpu.memory_space<vmem>>, vector<8x32xf32>
    tpu.vector_store %arg8[%c0_48, %c1312], %97 {strides = array<i32>} : memref<8x1568xf32, #tpu.memory_space<vmem>>, vector<8x32xf32>,
    %99 = vector.extract_strided_slice %14 {offsets = [336, 0], sizes = [8, 32], strides = [1, 1]} : vector<392x32xf32> to vector<8x32xf32>
    %c0_49 = arith.constant 0 : index
    %c1344 = arith.constant 1344 : index
    %100 = vector.load %arg8[%c0_49, %c1344] : memref<8x1568xf32, #tpu.memory_space<vmem>>, vector<8x32xf32>
    tpu.vector_store %arg8[%c0_49, %c1344], %99 {strides = array<i32>} : memref<8x1568xf32, #tpu.memory_space<vmem>>, vector<8x32xf32>,
    %101 = vector.extract_strided_slice %14 {offsets = [344, 0], sizes = [8, 32], strides = [1, 1]} : vector<392x32xf32> to vector<8x32xf32>
    %c0_50 = arith.constant 0 : index
    %c1376 = arith.constant 1376 : index
    %102 = vector.load %arg8[%c0_50, %c1376] : memref<8x1568xf32, #tpu.memory_space<vmem>>, vector<8x32xf32>
    tpu.vector_store %arg8[%c0_50, %c1376], %101 {strides = array<i32>} : memref<8x1568xf32, #tpu.memory_space<vmem>>, vector<8x32xf32>,
    %103 = vector.extract_strided_slice %14 {offsets = [352, 0], sizes = [8, 32], strides = [1, 1]} : vector<392x32xf32> to vector<8x32xf32>
    %c0_51 = arith.constant 0 : index
    %c1408 = arith.constant 1408 : index
    %104 = vector.load %arg8[%c0_51, %c1408] : memref<8x1568xf32, #tpu.memory_space<vmem>>, vector<8x32xf32>
    tpu.vector_store %arg8[%c0_51, %c1408], %103 {strides = array<i32>} : memref<8x1568xf32, #tpu.memory_space<vmem>>, vector<8x32xf32>,
    %105 = vector.extract_strided_slice %14 {offsets = [360, 0], sizes = [8, 32], strides = [1, 1]} : vector<392x32xf32> to vector<8x32xf32>
    %c0_52 = arith.constant 0 : index
    %c1440 = arith.constant 1440 : index
    %106 = vector.load %arg8[%c0_52, %c1440] : memref<8x1568xf32, #tpu.memory_space<vmem>>, vector<8x32xf32>
    tpu.vector_store %arg8[%c0_52, %c1440], %105 {strides = array<i32>} : memref<8x1568xf32, #tpu.memory_space<vmem>>, vector<8x32xf32>,
    %107 = vector.extract_strided_slice %14 {offsets = [368, 0], sizes = [8, 32], strides = [1, 1]} : vector<392x32xf32> to vector<8x32xf32>
    %c0_53 = arith.constant 0 : index
    %c1472 = arith.constant 1472 : index
    %108 = vector.load %arg8[%c0_53, %c1472] : memref<8x1568xf32, #tpu.memory_space<vmem>>, vector<8x32xf32>
    tpu.vector_store %arg8[%c0_53, %c1472], %107 {strides = array<i32>} : memref<8x1568xf32, #tpu.memory_space<vmem>>, vector<8x32xf32>,
    %109 = vector.extract_strided_slice %14 {offsets = [376, 0], sizes = [8, 32], strides = [1, 1]} : vector<392x32xf32> to vector<8x32xf32>
    %c0_54 = arith.constant 0 : index
    %c1504 = arith.constant 1504 : index
    %110 = vector.load %arg8[%c0_54, %c1504] : memref<8x1568xf32, #tpu.memory_space<vmem>>, vector<8x32xf32>
    tpu.vector_store %arg8[%c0_54, %c1504], %109 {strides = array<i32>} : memref<8x1568xf32, #tpu.memory_space<vmem>>, vector<8x32xf32>,
    %111 = vector.extract_strided_slice %14 {offsets = [384, 0], sizes = [8, 32], strides = [1, 1]} : vector<392x32xf32> to vector<8x32xf32>
    %c0_55 = arith.constant 0 : index
    %c1536 = arith.constant 1536 : index
    %112 = vector.load %arg8[%c0_55, %c1536] : memref<8x1568xf32, #tpu.memory_space<vmem>>, vector<8x32xf32>
    tpu.vector_store %arg8[%c0_55, %c1536], %111 {strides = array<i32>} : memref<8x1568xf32, #tpu.memory_space<vmem>>, vector<8x32xf32>,
    %c0_56 = arith.constant 0 : index
    %c0_57 = arith.constant 0 : index
    %113 = vector.load %arg8[%c0_56, %c0_57] : memref<8x1568xf32, #tpu.memory_space<vmem>>, vector<8x1568xf32>
    %c0_58 = arith.constant 0 : index
    %c0_59 = arith.constant 0 : index
    %114 = vector.load %arg3[%c0_58, %c0_59] : memref<1568x64xf32, #tpu.memory_space<vmem>>, vector<1568x64xf32>
    %cst_60 = arith.constant dense<0.000000e+00> : vector<8x64xf32>
    %115 = tpu.matmul %113, %114, %cst_60 {dimension_numbers = #tpu.dot_dimension_numbers<[1], [0], [0], [1], [0, 0, 1, 1], [], []>} : vector<8x1568xf32>, vector<1568x64xf32>, vector<8x64xf32> -> vector<8x64xf32>
    %c0_61 = arith.constant 0 : index
    %c0_62 = arith.constant 0 : index
    %116 = vector.load %arg4[%c0_61, %c0_62] : memref<1x64xf32, #tpu.memory_space<vmem>>, vector<1x64xf32>
    %117 = vector.broadcast %116 : vector<1x64xf32> to vector<8x64xf32>
    %118 = arith.addf %115, %117 : vector<8x64xf32>
    %cst_63 = arith.constant 0.000000e+00 : f32
    %119 = vector.broadcast %cst_63 : f32 to vector<8x64xf32>
    %120 = arith.maximumf %118, %119 : vector<8x64xf32>
    %c0_64 = arith.constant 0 : index
    %c0_65 = arith.constant 0 : index
    %121 = vector.load %arg5[%c0_64, %c0_65] : memref<64x6xf32, #tpu.memory_space<vmem>>, vector<64x6xf32>
    %cst_66 = arith.constant dense<0.000000e+00> : vector<8x6xf32>
    %122 = tpu.matmul %120, %121, %cst_66 {dimension_numbers = #tpu.dot_dimension_numbers<[1], [0], [0], [1], [0, 0, 1, 1], [], []>} : vector<8x64xf32>, vector<64x6xf32>, vector<8x6xf32> -> vector<8x6xf32>
    %c0_67 = arith.constant 0 : index
    %c0_68 = arith.constant 0 : index
    %123 = vector.load %arg6[%c0_67, %c0_68] : memref<1x6xf32, #tpu.memory_space<vmem>>, vector<1x6xf32>
    %124 = vector.broadcast %123 : vector<1x6xf32> to vector<8x6xf32>
    %125 = arith.addf %122, %124 : vector<8x6xf32>
    %c0_69 = arith.constant 0 : index
    %c0_70 = arith.constant 0 : index
    %126 = vector.load %arg7[%c0_69, %c0_70] : memref<8x6xf32, #tpu.memory_space<vmem>>, vector<8x6xf32>
    tpu.vector_store %arg7[%c0_69, %c0_70], %125 {strides = array<i32>} : memref<8x6xf32, #tpu.memory_space<vmem>>, vector<8x6xf32>,
    return
  }
}

</mosaic_0001>

<bundles_post_ra>
// kernel: step1_forward.1
= control target key start
LH: loop header
LB: loop body
LE: loop exit
PB: predicated region body
PF: predicated region fallthrough
CT: control target
= control target key end

     0   :  { %v4413_v0 = vmov 0.0|0.0   ;;  %vm2743_vm0 = vmmov 0   ;;  %v4411_v4 = vmov 0.0   ;;  %s2745_s10 = smov 96   ;;  %s2747_s22 = smov 32   ;;  %vm996_vm1 = vcmask 261120   ;;  %s4403_s1 = inlined_call_operand.vmem [shape: f32[128,128], index: 1, kind: input, shape index: {}]   ;;  %s4404_s0 = inlined_call_operand.vmem [shape: f32[392,128], index: 0, kind: input, shape index: {}]   ;;  %s4405_s2 = inlined_call_operand.vmem [shape: f32[1,32], index: 2, kind: input, shape index: {}]   ;;  %s4406_s3 = inlined_call_operand.vmem [shape: f32[1568,64], index: 3, kind: input, shape index: {}]   ;;  %s4407_s4 = inlined_call_operand.vmem [shape: f32[1,64], index: 4, kind: input, shape index: {}]   ;;  %s4408_s5 = inlined_call_operand.vmem [shape: f32[64,6], index: 5, kind: input, shape index: {}]   ;;  %s4409_s6 = inlined_call_operand.vmem [shape: f32[1,6], index: 6, kind: input, shape index: {}]   ;;  %s4410_s7 = inlined_call_operand.vmem [shape: f32[8,6], index: 7, kind: output, shape index: {}]  }
   0x1   :  { %2501 = vmatprep.subr.bf16.mxu0 %v4413_v0  ;;  %v75_v1 = vld [vmem:[%s4403_s1] sm:$0xff]  ;;  %v76_v2 = vld [vmem:[%s4403_s1 + $0x8] sm:$0xff]  ;;  %v77_v3 = vld [vmem:[%s4403_s1 + $0x10] sm:$0xff]  ;;  %2324 = vmatprep.mubr.msk.f32.mxu0 %vm2743_vm0, %v4411_v4  ;;  %vm1002_vm2 = vcmask 523520   ;;  %vm1008_vm3 = vcmask 785920   ;;  %vm1014_vm4 = vcmask 1048320  }
   0x2   :  { %v2502_v5 = vpack.c.bf16 %v76_v2, %v75_v1  ;;  %v78_v6 = vld [vmem:[%s4403_s1 + $0x18] sm:$0xff]  ;;  %v79_v8 = vld [vmem:[%s4403_s1 + $0x20] sm:$0xff]  ;;  %v80_v9 = vld [vmem:[%s4403_s1 + $0x28] sm:$0xff]  ;;  %vm1918_vm5 = vcmask 523264   ;;  %vm1992_vm6 = vcmask 48128  }
   0x3   :  { %v2505_v7 = vpack.c.bf16 %v78_v6, %v77_v3  ;;  %v2508_v10 = vpack.c.bf16 %v80_v9, %v79_v8  ;;  %v81_v11 = vld [vmem:[%s4403_s1 + $0x30] sm:$0xff]  ;;  %v82_v12 = vld [vmem:[%s4403_s1 + $0x38] sm:$0xff]  ;;  %v83_v14 = vld [vmem:[%s4403_s1 + $0x40] sm:$0xff] }
   0x4   :  { %2503 = vmatpush3.bf16.msra.mxu0 %v2502_v5  ;;  %v2511_v13 = vpack.c.bf16 %v82_v12, %v81_v11  ;;  %v84_v15 = vld [vmem:[%s4403_s1 + $0x48] sm:$0xff]  ;;  %v85_v17 = vld [vmem:[%s4403_s1 + $0x50] sm:$0xff]  ;;  %v86_v18 = vld [vmem:[%s4403_s1 + $0x58] sm:$0xff] }
   0x5   :  { %2504 = vmatprep.subr.bf16.mxu0 %v4413_v0  ;;  %v2514_v16 = vpack.c.bf16 %v84_v15, %v83_v14  ;;  %v2517_v19 = vpack.c.bf16 %v86_v18, %v85_v17  ;;  %v87_v20 = vld [vmem:[%s4403_s1 + $0x60] sm:$0xff]  ;;  %v88_v21 = vld [vmem:[%s4403_s1 + $0x68] sm:$0xff]  ;;  %v89_v23 = vld [vmem:[%s4403_s1 + $0x70] sm:$0xff] }
   0x6   :  { %v2520_v22 = vpack.c.bf16 %v88_v21, %v87_v20  ;;  %v90_v24 = vld [vmem:[%s4403_s1 + $0x78] sm:$0xff]  ;;  %v26_v26 = vld [vmem:[%s4404_s0] sm:$0xff]  ;;  %v27_v27 = vld [vmem:[%s4404_s0 + $0x8] sm:$0xff] }
   0x7   :  { %v2523_v25 = vpack.c.bf16 %v90_v24, %v89_v23  ;;  %v28_v28 = vld [vmem:[%s4404_s0 + $0x10] sm:$0xff]  ;;  %v29_v29 = vld [vmem:[%s4404_s0 + $0x18] sm:$0xff]  ;;  %v30_v30 = vld [vmem:[%s4404_s0 + $0x20] sm:$0xff] }
   0x8   :  { %2506 = vmatpush3.bf16.msra.mxu0 %v2505_v7  ;;  %v31_v31 = vld [vmem:[%s4404_s0 + $0x28] sm:$0xff]  ;;  %v32_v32 = vld [vmem:[%s4404_s0 + $0x30] sm:$0xff]  ;;  %v33_v33 = vld [vmem:[%s4404_s0 + $0x38] sm:$0xff] }
   0x9   :  { %2507 = vmatprep.subr.bf16.mxu0 %v4413_v0  ;;  %v34_v34 = vld [vmem:[%s4404_s0 + $0x40] sm:$0xff]  ;;  %v35_v35 = vld [vmem:[%s4404_s0 + $0x48] sm:$0xff]  ;;  %v36_v36 = vld [vmem:[%s4404_s0 + $0x50] sm:$0xff] }
   0xa   :  { %v37_v37 = vld [vmem:[%s4404_s0 + $0x58] sm:$0xff]  ;;  %v38_v38 = vld [vmem:[%s4404_s0 + $0x60] sm:$0xff]  ;;  %v39_v39 = vld [vmem:[%s4404_s0 + $0x68] sm:$0xff] }
   0xb   :  { %v40_v40 = vld [vmem:[%s4404_s0 + $0x70] sm:$0xff]  ;;  %v41_v41 = vld [vmem:[%s4404_s0 + $0x78] sm:$0xff]  ;;  %v42_v42 = vld [vmem:[%s4404_s0 + $0x80] sm:$0xff] }
   0xc   :  { %2509 = vmatpush3.bf16.msra.mxu0 %v2508_v10  ;;  %v43_v43 = vld [vmem:[%s4404_s0 + $0x88] sm:$0xff]  ;;  %v44_v44 = vld [vmem:[%s4404_s0 + $0x90] sm:$0xff]  ;;  %v45_v45 = vld [vmem:[%s4404_s0 + $0x98] sm:$0xff] }
   0xd   :  { %2510 = vmatprep.subr.bf16.mxu0 %v4413_v0  ;;  %v46_v46 = vld [vmem:[%s4404_s0 + $0xa0] sm:$0xff]  ;;  %v47_v47 = vld [vmem:[%s4404_s0 + $0xa8] sm:$0xff]  ;;  %v48_v48 = vld [vmem:[%s4404_s0 + $0xb0] sm:$0xff] }
   0xe   :  { %v49_v49 = vld [vmem:[%s4404_s0 + $0xb8] sm:$0xff]  ;;  %v50_v50 = vld [vmem:[%s4404_s0 + $0xc0] sm:$0xff]  ;;  %v51_v51 = vld [vmem:[%s4404_s0 + $0xc8] sm:$0xff] }
   0xf   :  { %v52_v52 = vld [vmem:[%s4404_s0 + $0xd0] sm:$0xff]  ;;  %v53_v53 = vld [vmem:[%s4404_s0 + $0xd8] sm:$0xff]  ;;  %v54_v54 = vld [vmem:[%s4404_s0 + $0xe0] sm:$0xff] }
  0x10   :  { %2512 = vmatpush3.bf16.msra.mxu0 %v2511_v13  ;;  %v55_v55 = vld [vmem:[%s4404_s0 + $0xe8] sm:$0xff]  ;;  %v56_v56 = vld [vmem:[%s4404_s0 + $0xf0] sm:$0xff]  ;;  %v57_v57 = vld [vmem:[%s4404_s0 + $0xf8] sm:$0xff] }
  0x11   :  { %2513 = vmatprep.subr.bf16.mxu0 %v4413_v0  ;;  %v58_v58 = vld [vmem:[%s4404_s0 + $0x100] sm:$0xff]  ;;  %v59_v59 = vld [vmem:[%s4404_s0 + $0x108] sm:$0xff]  ;;  %v60_v60 = vld [vmem:[%s4404_s0 + $0x110] sm:$0xff] }
  0x12   :  { %v61_v61 = vld [vmem:[%s4404_s0 + $0x118] sm:$0xff]  ;;  %v62_v62 = vld [vmem:[%s4404_s0 + $0x120] sm:$0xff]  ;;  %v63_v63 = vld [vmem:[%s4404_s0 + $0x128] sm:$0xff] }
  0x13   :  { %v64_v1 = vld [vmem:[%s4404_s0 + $0x130] sm:$0xff]  ;;  %v65_v2 = vld [vmem:[%s4404_s0 + $0x138] sm:$0xff]  ;;  %v66_v3 = vld [vmem:[%s4404_s0 + $0x140] sm:$0xff] }
  0x14   :  { %2515 = vmatpush3.bf16.msra.mxu0 %v2514_v16  ;;  %v67_v5 = vld [vmem:[%s4404_s0 + $0x148] sm:$0xff]  ;;  %v68_v6 = vld [vmem:[%s4404_s0 + $0x150] sm:$0xff]  ;;  %v69_v7 = vld [vmem:[%s4404_s0 + $0x158] sm:$0xff] }
  0x15   :  { %2516 = vmatprep.subr.bf16.mxu0 %v4413_v0  ;;  %v70_v8 = vld [vmem:[%s4404_s0 + $0x160] sm:$0xff]  ;;  %v71_v9 = vld [vmem:[%s4404_s0 + $0x168] sm:$0xff]  ;;  %v72_v10 = vld [vmem:[%s4404_s0 + $0x170] sm:$0xff] }
  0x16   :  { %v73_v11 = vld [vmem:[%s4404_s0 + $0x178] sm:$0xff] }
  0x18   :  { %2518 = vmatpush3.bf16.msra.mxu0 %v2517_v19 }
  0x19   :  { %2519 = vmatprep.subr.bf16.mxu0 %v4413_v0 }
  0x1c   :  { %2521 = vmatpush3.bf16.msra.mxu0 %v2520_v22 }
  0x1d   :  { %2522 = vmatprep.subr.bf16.mxu0 %v4413_v0 }
  0x20   :  { %2524 = vmatpush3.bf16.msra.mxu0 %v2523_v25 }
  0x23   :  { %2325 = vmatmul.mubr.f32.vlgmr.msra.gmra.mrb[0].mxu0 %v26_v26 }
  0x24   :  { %2327 = vmatprep.mubr.msk.f32.mxu0 %vm2743_vm0, %v4411_v4 }
  0x27   :  { %2328 = vmatmul.mubr.f32.gmra.mrb[2].mxu0 %v27_v27 }
  0x28   :  { %2330 = vmatprep.mubr.msk.f32.mxu0 %vm2743_vm0, %v4411_v4 }
  0x2b   :  { %2331 = vmatmul.mubr.f32.gmra.mrb[4].mxu0 %v28_v28 }
  0x2c   :  { %2333 = vmatprep.mubr.msk.f32.mxu0 %vm2743_vm0, %v4411_v4 }
  0x2f   :  { %2334 = vmatmul.mubr.f32.gmra.mrb[6].mxu0 %v29_v29 }
  0x30   :  { %2336 = vmatprep.mubr.msk.f32.mxu0 %vm2743_vm0, %v4411_v4 }
  0x33   :  { %2337 = vmatmul.mubr.f32.gmra.mrb[8].mxu0 %v30_v30 }
  0x34   :  { %2339 = vmatprep.mubr.msk.f32.mxu0 %vm2743_vm0, %v4411_v4 }
  0x37   :  { %2340 = vmatmul.mubr.f32.gmra.mrb[10].mxu0 %v31_v31 }
  0x38   :  { %2342 = vmatprep.mubr.msk.f32.mxu0 %vm2743_vm0, %v4411_v4 }
  0x3b   :  { %2343 = vmatmul.mubr.f32.gmra.mrb[12].mxu0 %v32_v32 }
  0x3c   :  { %2345 = vmatprep.mubr.msk.f32.mxu0 %vm2743_vm0, %v4411_v4 }
  0x3f   :  { %2346 = vmatmul.mubr.f32.gmra.mrb[14].mxu0 %v33_v33 }
  0x40   :  { %2348 = vmatprep.mubr.msk.f32.mxu0 %vm2743_vm0, %v4411_v4 }
  0x43   :  { %2349 = vmatmul.mubr.f32.gmra.mrb[16].mxu0 %v34_v34 }
  0x44   :  { %2351 = vmatprep.mubr.msk.f32.mxu0 %vm2743_vm0, %v4411_v4 }
  0x47   :  { %2352 = vmatmul.mubr.f32.gmra.mrb[18].mxu0 %v35_v35 }
  0x48   :  { %2354 = vmatprep.mubr.msk.f32.mxu0 %vm2743_vm0, %v4411_v4 }
  0x4b   :  { %2355 = vmatmul.mubr.f32.gmra.mrb[20].mxu0 %v36_v36 }
  0x4c   :  { %2357 = vmatprep.mubr.msk.f32.mxu0 %vm2743_vm0, %v4411_v4 }
  0x4f   :  { %2358 = vmatmul.mubr.f32.gmra.mrb[22].mxu0 %v37_v37 }
  0x50   :  { %2360 = vmatprep.mubr.msk.f32.mxu0 %vm2743_vm0, %v4411_v4 }
  0x53   :  { %2361 = vmatmul.mubr.f32.gmra.mrb[24].mxu0 %v38_v38 }
  0x54   :  { %2363 = vmatprep.mubr.msk.f32.mxu0 %vm2743_vm0, %v4411_v4 }
  0x57   :  { %2364 = vmatmul.mubr.f32.gmra.mrb[26].mxu0 %v39_v39 }
  0x58   :  { %2366 = vmatprep.mubr.msk.f32.mxu0 %vm2743_vm0, %v4411_v4 }
  0x5b   :  { %2367 = vmatmul.mubr.f32.gmra.mrb[28].mxu0 %v40_v40 }
  0x5c   :  { %2369 = vmatprep.mubr.msk.f32.mxu0 %vm2743_vm0, %v4411_v4 }
  0x5f   :  { %2370 = vmatmul.mubr.f32.gmra.mrb[30].mxu0 %v41_v41 }
  0x60   :  { %2372 = vmatprep.mubr.msk.f32.mxu0 %vm2743_vm0, %v4411_v4 }
  0x63   :  { %2373 = vmatmul.mubr.f32.gmra.mrb[32].mxu0 %v42_v42 }
  0x64   :  { %2375 = vmatprep.mubr.msk.f32.mxu0 %vm2743_vm0, %v4411_v4 }
  0x67   :  { %2376 = vmatmul.mubr.f32.gmra.mrb[34].mxu0 %v43_v43 }
  0x68   :  { %2378 = vmatprep.mubr.msk.f32.mxu0 %vm2743_vm0, %v4411_v4 }
  0x6b   :  { %2379 = vmatmul.mubr.f32.gmra.mrb[36].mxu0 %v44_v44 }
  0x6c   :  { %2381 = vmatprep.mubr.msk.f32.mxu0 %vm2743_vm0, %v4411_v4 }
  0x6f   :  { %2382 = vmatmul.mubr.f32.gmra.mrb[38].mxu0 %v45_v45 }
  0x70   :  { %2384 = vmatprep.mubr.msk.f32.mxu0 %vm2743_vm0, %v4411_v4 }
  0x73   :  { %2385 = vmatmul.mubr.f32.gmra.mrb[40].mxu0 %v46_v46 }
  0x74   :  { %2387 = vmatprep.mubr.msk.f32.mxu0 %vm2743_vm0, %v4411_v4 }
  0x77   :  { %2388 = vmatmul.mubr.f32.gmra.mrb[42].mxu0 %v47_v47 }
  0x78   :  { %2390 = vmatprep.mubr.msk.f32.mxu0 %vm2743_vm0, %v4411_v4 }
  0x7b   :  { %2391 = vmatmul.mubr.f32.gmra.mrb[44].mxu0 %v48_v48 }
  0x7c   :  { %2393 = vmatprep.mubr.msk.f32.mxu0 %vm2743_vm0, %v4411_v4 }
  0x7f   :  { %2394 = vmatmul.mubr.f32.gmra.mrb[46].mxu0 %v49_v49 }
  0x80   :  { %2396 = vmatprep.mubr.msk.f32.mxu0 %vm2743_vm0, %v4411_v4 }
  0x83   :  { %2397 = vmatmul.mubr.f32.gmra.mrb[48].mxu0 %v50_v50 }
  0x84   :  { %2399 = vmatprep.mubr.msk.f32.mxu0 %vm2743_vm0, %v4411_v4 }
  0x87   :  { %2400 = vmatmul.mubr.f32.gmra.mrb[50].mxu0 %v51_v51 }
  0x88   :  { %2402 = vmatprep.mubr.msk.f32.mxu0 %vm2743_vm0, %v4411_v4 }
  0x8b   :  { %2403 = vmatmul.mubr.f32.gmra.mrb[52].mxu0 %v52_v52 }
  0x8c   :  { %2405 = vmatprep.mubr.msk.f32.mxu0 %vm2743_vm0, %v4411_v4 }
  0x8f   :  { %2406 = vmatmul.mubr.f32.gmra.mrb[54].mxu0 %v53_v53 }
  0x90   :  { %2408 = vmatprep.mubr.msk.f32.mxu0 %vm2743_vm0, %v4411_v4 }
  0x93   :  { %2409 = vmatmul.mubr.f32.gmra.mrb[56].mxu0 %v54_v54 }
  0x94   :  { %2411 = vmatprep.mubr.msk.f32.mxu0 %vm2743_vm0, %v4411_v4 }
  0x97   :  { %2412 = vmatmul.mubr.f32.gmra.mrb[58].mxu0 %v55_v55 }
  0x98   :  { %2414 = vmatprep.mubr.msk.f32.mxu0 %vm2743_vm0, %v4411_v4 }
  0x9b   :  { %2415 = vmatmul.mubr.f32.gmra.mrb[60].mxu0 %v56_v56 }
  0x9c   :  { %2417 = vmatprep.mubr.msk.f32.mxu0 %vm2743_vm0, %v4411_v4 }
  0x9f   :  { %2418 = vmatmul.mubr.f32.gmra.mrb[62].mxu0 %v57_v57 }
  0xa0   :  { %2420 = vmatprep.mubr.msk.f32.mxu0 %vm2743_vm0, %v4411_v4 }
  0xa3   :  { %2421 = vmatmul.mubr.f32.gmra.mrb[64].mxu0 %v58_v58 }
  0xa4   :  { %2423 = vmatprep.mubr.msk.f32.mxu0 %vm2743_vm0, %v4411_v4 }
  0xa7   :  { %2424 = vmatmul.mubr.f32.gmra.mrb[66].mxu0 %v59_v59 }
  0xa8   :  { %2426 = vmatprep.mubr.msk.f32.mxu0 %vm2743_vm0, %v4411_v4 }
  0xab   :  { %2427 = vmatmul.mubr.f32.gmra.mrb[68].mxu0 %v60_v60  ;;  %v74_v60 = vld [vmem:[%s4404_s0 + $0x180] sm:$0xff]  ;;  %s2746_s0 = smov 64  }
  0xac   :  { %2429 = vmatprep.mubr.msk.f32.mxu0 %vm2743_vm0, %v4411_v4 }
  0xaf   :  { %2430 = vmatmul.mubr.f32.gmra.mrb[70].mxu0 %v61_v61 }
  0xb0   :  { %2432 = vmatprep.mubr.msk.f32.mxu0 %vm2743_vm0, %v4411_v4 }
  0xb3   :  { %2433 = vmatmul.mubr.f32.gmra.mrb[72].mxu0 %v62_v62 }
  0xb4   :  { %2435 = vmatprep.mubr.msk.f32.mxu0 %vm2743_vm0, %v4411_v4 }
  0xb7   :  { %2436 = vmatmul.mubr.f32.gmra.mrb[74].mxu0 %v63_v63 }
  0xb8   :  { %2438 = vmatprep.mubr.msk.f32.mxu0 %vm2743_vm0, %v4411_v4 }
  0xbb   :  { %2439 = vmatmul.mubr.f32.gmra.mrb[76].mxu0 %v64_v1 }
  0xbc   :  { %2441 = vmatprep.mubr.msk.f32.mxu0 %vm2743_vm0, %v4411_v4 }
  0xbf   :  { %2442 = vmatmul.mubr.f32.gmra.mrb[78].mxu0 %v65_v2 }
  0xc0   :  { %2444 = vmatprep.mubr.msk.f32.mxu0 %vm2743_vm0, %v4411_v4 }
  0xc3   :  { %2445 = vmatmul.mubr.f32.gmra.mrb[80].mxu0 %v66_v3 }
  0xc4   :  { %2447 = vmatprep.mubr.msk.f32.mxu0 %vm2743_vm0, %v4411_v4 }
  0xc7   :  { %2448 = vmatmul.mubr.f32.gmra.mrb[82].mxu0 %v67_v5 }
  0xc8   :  { %2450 = vmatprep.mubr.msk.f32.mxu0 %vm2743_vm0, %v4411_v4 }
  0xcb   :  { %2451 = vmatmul.mubr.f32.gmra.mrb[84].mxu0 %v68_v6 }
  0xcc   :  { %2453 = vmatprep.mubr.msk.f32.mxu0 %vm2743_vm0, %v4411_v4 }
  0xcf   :  { %2454 = vmatmul.mubr.f32.gmra.mrb[86].mxu0 %v69_v7 }
  0xd0   :  { %2456 = vmatprep.mubr.msk.f32.mxu0 %vm2743_vm0, %v4411_v4 }
  0xd3   :  { %2457 = vmatmul.mubr.f32.gmra.mrb[88].mxu0 %v70_v8 }
  0xd4   :  { %2459 = vmatprep.mubr.msk.f32.mxu0 %vm2743_vm0, %v4411_v4 }
  0xd7   :  { %2460 = vmatmul.mubr.f32.gmra.mrb[90].mxu0 %v71_v9 }
  0xd8   :  { %2462 = vmatprep.mubr.msk.f32.mxu0 %vm2743_vm0, %v4411_v4 }
  0xdb   :  { %2463 = vmatmul.mubr.f32.gmra.mrb[92].mxu0 %v72_v10 }
  0xdc   :  { %2465 = vmatprep.mubr.msk.f32.mxu0 %vm2743_vm0, %v4411_v4 }
  0xdf   :  { %2466 = vmatmul.mubr.f32.gmra.mrb[94].mxu0 %v73_v11 }
  0xe0   :  { %2468 = vmatprep.mubr.msk.f32.mxu0 %vm2743_vm0, %v4411_v4  ;;  %v1206_v4 = vld [vmem:[%s4406_s3] sm:$0xff] }
  0xe3   :  { %2469 = vmatmul.mubr.f32.gmra.mrb[96].mxu0 %v74_v60 }
  0xf6   :  { %v3086_v12 = vpop.f32.mrb[0].mxu0 }
  0xf7   :  { %v2326_v13 = vpop.f32.mrb[1].mxu0 }
  0xfa   :  { %v3088_v14 = vpop.f32.mrb[2].mxu0 }
  0xfb   :  { %452 = vrot.lane.b32.xlu0 %v3088_v14, %s2745_s10  ;;  %v2329_v15 = vpop.f32.mrb[3].mxu0 }
  0xfe   :  { %v3092_v16 = vpop.f32.mrb[4].mxu0 }
  0xff   :  { %454 = vrot.lane.b32.xlu1 %v3092_v16, %s2745_s10  ;;  %v2332_v17 = vpop.f32.mrb[5].mxu0 }
 0x102   :  { %v3096_v18 = vpop.f32.mrb[6].mxu0 }
 0x103   :  { %v2335_v19 = vpop.f32.mrb[7].mxu0 }
 0x106   :  { %v3098_v20 = vpop.f32.mrb[8].mxu0 }
 0x107   :  { %v2338_v21 = vpop.f32.mrb[9].mxu0 }
 0x10a   :  { %v3100_v22 = vpop.f32.mrb[10].mxu0 }
 0x10b   :  { %460 = vrot.lane.b32.xlu0 %v3100_v22, %s2745_s10  ;;  %v2341_v23 = vpop.f32.mrb[11].mxu0 }
 0x10e   :  { %v3104_v24 = vpop.f32.mrb[12].mxu0 }
 0x10f   :  { %462 = vrot.lane.b32.xlu1 %v3104_v24, %s2745_s10  ;;  %v2344_v25 = vpop.f32.mrb[13].mxu0 }
 0x112   :  { %v3108_v26 = vpop.f32.mrb[14].mxu0 }
 0x113   :  { %456 = vrot.lane.b32.xlu1 %v3096_v18, %s2745_s10  ;;  %464 = vrot.lane.b32.xlu0 %v3108_v26, %s2745_s10  ;;  %v2347_v27 = vpop.f32.mrb[15].mxu0 }
 0x116   :  { %v3114_v28 = vpop.f32.mrb[16].mxu0 }
 0x117   :  { %450 = vrot.lane.b32.xlu1 %v3086_v12, %s2745_s10  ;;  %458 = vrot.lane.b32.xlu0 %v3098_v20, %s2745_s10  ;;  %v2350_v29 = vpop.f32.mrb[17].mxu0 }
 0x11a   :  { %v3120_v30 = vpop.f32.mrb[18].mxu0 }
 0x11b   :  { %466 = vrot.lane.b32.xlu1 %v3114_v28, %s2745_s10  ;;  %v2353_v31 = vpop.f32.mrb[19].mxu0 }
 0x11e   :  { %v3124_v32 = vpop.f32.mrb[20].mxu0 }
 0x11f   :  { %468 = vrot.lane.b32.xlu1 %v3120_v30, %s2745_s10  ;;  %v2356_v33 = vpop.f32.mrb[21].mxu0 }
 0x122   :  { %v3128_v34 = vpop.f32.mrb[22].mxu0 }
 0x123   :  { %470 = vrot.lane.b32.xlu1 %v3124_v32, %s2745_s10  ;;  %v2359_v35 = vpop.f32.mrb[23].mxu0 }
 0x126   :  { %v3132_v36 = vpop.f32.mrb[24].mxu0 }
 0x127   :  { %472 = vrot.lane.b32.xlu1 %v3128_v34, %s2745_s10  ;;  %474 = vrot.lane.b32.xlu0 %v3132_v36, %s2745_s10  ;;  %v2362_v37 = vpop.f32.mrb[25].mxu0 }
 0x12a   :  { %v3138_v38 = vpop.f32.mrb[26].mxu0 }
 0x12b   :  { %476 = vrot.lane.b32.xlu0 %v3138_v38, %s2745_s10  ;;  %v2365_v39 = vpop.f32.mrb[27].mxu0 }
 0x12e   :  { %v3142_v40 = vpop.f32.mrb[28].mxu0 }
 0x12f   :  { %478 = vrot.lane.b32.xlu0 %v3142_v40, %s2745_s10  ;;  %v2368_v41 = vpop.f32.mrb[29].mxu0 }
 0x132   :  { %v3146_v42 = vpop.f32.mrb[30].mxu0 }
 0x133   :  { %480 = vrot.lane.b32.xlu0 %v3146_v42, %s2745_s10  ;;  %v2371_v43 = vpop.f32.mrb[31].mxu0 }
 0x136   :  { %v3150_v44 = vpop.f32.mrb[32].mxu0 }
 0x137   :  { %v2374_v45 = vpop.f32.mrb[33].mxu0 }
 0x13a   :  { %v3152_v46 = vpop.f32.mrb[34].mxu0 }
 0x13b   :  { %484 = vrot.lane.b32.xlu1 %v3152_v46, %s2745_s10  ;;  %v2377_v47 = vpop.f32.mrb[35].mxu0 }
 0x13e   :  { %v3156_v48 = vpop.f32.mrb[36].mxu0 }
 0x13f   :  { %486 = vrot.lane.b32.xlu1 %v3156_v48, %s2745_s10  ;;  %v2380_v49 = vpop.f32.mrb[37].mxu0 }
 0x142   :  { %v3160_v50 = vpop.f32.mrb[38].mxu0 }
 0x143   :  { %488 = vrot.lane.b32.xlu1 %v3160_v50, %s2745_s10  ;;  %v2383_v51 = vpop.f32.mrb[39].mxu0 }
 0x146   :  { %v3164_v52 = vpop.f32.mrb[40].mxu0 }
 0x147   :  { %v2386_v53 = vpop.f32.mrb[41].mxu0 }
 0x14a   :  { %v3166_v54 = vpop.f32.mrb[42].mxu0 }
 0x14b   :  { %492 = vrot.lane.b32.xlu0 %v3166_v54, %s2745_s10  ;;  %v2389_v55 = vpop.f32.mrb[43].mxu0 }
 0x14e   :  { %v3170_v56 = vpop.f32.mrb[44].mxu0 }
 0x14f   :  { %494 = vrot.lane.b32.xlu0 %v3170_v56, %s2745_s10  ;;  %v2392_v57 = vpop.f32.mrb[45].mxu0 }
 0x152   :  { %v3174_v58 = vpop.f32.mrb[46].mxu0 }
 0x153   :  { %496 = vrot.lane.b32.xlu0 %v3174_v58, %s2745_s10  ;;  %v2395_v59 = vpop.f32.mrb[47].mxu0 }
 0x156   :  { %v3181_v61 = vpop.f32.mrb[48].mxu0 }
 0x157   :  { %v2398_v62 = vpop.f32.mrb[49].mxu0 }
 0x15a   :  { %v3183_v63 = vpop.f32.mrb[50].mxu0 }
 0x15b   :  { %500 = vrot.lane.b32.xlu1 %v3183_v63, %s2745_s10  ;;  %v2401_v1 = vpop.f32.mrb[51].mxu0 }
 0x15e   :  { %v3187_v2 = vpop.f32.mrb[52].mxu0 }
 0x15f   :  { %502 = vrot.lane.b32.xlu1 %v3187_v2, %s2745_s10  ;;  %v2404_v3 = vpop.f32.mrb[53].mxu0 }
 0x162   :  { %v3191_v5 = vpop.f32.mrb[54].mxu0 }
 0x163   :  { %504 = vrot.lane.b32.xlu1 %v3191_v5, %s2745_s10  ;;  %v2407_v6 = vpop.f32.mrb[55].mxu0 }
 0x166   :  { %v3195_v7 = vpop.f32.mrb[56].mxu0 }
 0x167   :  { %v2410_v8 = vpop.f32.mrb[57].mxu0 }
 0x16a   :  { %v3197_v9 = vpop.f32.mrb[58].mxu0 }
 0x16b   :  { %508 = vrot.lane.b32.xlu0 %v3197_v9, %s2745_s10  ;;  %v2413_v10 = vpop.f32.mrb[59].mxu0 }
 0x16d   :  { %v453_v11 = vpop.permute.xlu0 %452 }
 0x16e   :  { %v3202_v13 = vmax.f32 %v3088_v14, %v453_v11  ;;  %v3204_v15 = vpop.f32.mrb[60].mxu0 }
 0x16f   :  { %510 = vrot.lane.b32.xlu0 %v3204_v15, %s2745_s10  ;;  %v2416_v17 = vpop.f32.mrb[61].mxu0 }
 0x170   :  { %697 = vrot.lane.b32.xlu1 %v3202_v13, %s2746_s0 }
 0x171   :  { %v455_v19 = vpop.permute.xlu1 %454 }
 0x172   :  { %v3211_v21 = vmax.f32 %v3092_v16, %v455_v19  ;;  %v3213_v23 = vpop.f32.mrb[62].mxu0 }
 0x173   :  { %512 = vrot.lane.b32.xlu0 %v3213_v23, %s2745_s10  ;;  %v2419_v14 = vpop.f32.mrb[63].mxu0 }
 0x174   :  { %699 = vrot.lane.b32.xlu1 %v3211_v21, %s2746_s0 }
 0x176   :  { %v3219_v25 = vpop.f32.mrb[64].mxu0 }
 0x177   :  { %v2422_v27 = vpop.f32.mrb[65].mxu0 }
 0x17a   :  { %v3221_v29 = vpop.f32.mrb[66].mxu0 }
 0x17b   :  { %v2425_v31 = vpop.f32.mrb[67].mxu0 }
 0x17d   :  { %v461_v33 = vpop.permute.xlu0 %460 }
 0x17e   :  { %v3224_v35 = vmax.f32 %v3100_v22, %v461_v33  ;;  %v3226_v16 = vpop.f32.mrb[68].mxu0 }
 0x17f   :  { %v2428_v37 = vpop.f32.mrb[69].mxu0 }
 0x180   :  { %705 = vrot.lane.b32.xlu0 %v3224_v35, %s2746_s0 }
 0x181   :  { %v463_v39 = vpop.permute.xlu1 %462 }
 0x182   :  { %v3231_v41 = vmax.f32 %v3104_v24, %v463_v39  ;;  %v3233_v43 = vpop.f32.mrb[70].mxu0 }
 0x183   :  { %v2431_v45 = vpop.f32.mrb[71].mxu0 }
 0x184   :  { %707 = vrot.lane.b32.xlu0 %v3231_v41, %s2746_s0 }
 0x185   :  { %v457_v47 = vpop.permute.xlu1 %456  ;;  %v465_v49 = vpop.permute.xlu0 %464 }
 0x186   :  { %v3238_v22 = vmax.f32 %v3096_v18, %v457_v47  ;;  %v3241_v51 = vmax.f32 %v3108_v26, %v465_v49  ;;  %v3243_v53 = vpop.f32.mrb[72].mxu0 }
 0x187   :  { %v2434_v55 = vpop.f32.mrb[73].mxu0 }
 0x188   :  { %701 = vrot.lane.b32.xlu1 %v3238_v22, %s2746_s0  ;;  %709 = vrot.lane.b32.xlu0 %v3241_v51, %s2746_s0 }
 0x189   :  { %v451_v24 = vpop.permute.xlu1 %450  ;;  %v459_v57 = vpop.permute.xlu0 %458 }
 0x18a   :  { %v3250_v59 = vmax.f32 %v3086_v12, %v451_v24  ;;  %v3253_v18 = vmax.f32 %v3098_v20, %v459_v57  ;;  %v3255_v60 = vpop.f32.mrb[74].mxu0 }
 0x18b   :  { %v2437_v26 = vpop.f32.mrb[75].mxu0 }
 0x18c   :  { %695 = vrot.lane.b32.xlu1 %v3250_v59, %s2746_s0  ;;  %703 = vrot.lane.b32.xlu0 %v3253_v18, %s2746_s0 }
 0x18d   :  { %v467_v12 = vpop.permute.xlu1 %466 }
 0x18e   :  { %v3261_v62 = vpop.f32.mrb[76].mxu0 }
 0x18f   :  { %v2440_v1 = vpop.f32.mrb[77].mxu0 }
 0x190   :  { %482 = vrot.lane.b32.xlu1 %v3150_v44, %s2745_s10  ;;  %490 = vrot.lane.b32.xlu0 %v3164_v52, %s2745_s10  ;;  %v3322_v1 = vmax.f32 %v3114_v28, %v467_v12 }
 0x191   :  { %v469_v8 = vpop.permute.xlu1 %468 }
 0x192   :  { %v3267_v20 = vpop.f32.mrb[78].mxu0  ;;  %v3286_v31 = vmax.f32 %v3120_v30, %v469_v8 }
 0x193   :  { %v2443_v3 = vpop.f32.mrb[79].mxu0 }
 0x194   :  { %516 = vrot.lane.b32.xlu1 %v3221_v29, %s2745_s10  ;;  %524 = vrot.lane.b32.xlu0 %v3255_v60, %s2745_s10 }
 0x195   :  { %v471_v14 = vpop.permute.xlu1 %470 }
 0x196   :  { %v3273_v6 = vpop.f32.mrb[80].mxu0  ;;  %v3298_v47 = vmax.f32 %v3124_v32, %v471_v14 }
 0x197   :  { %v2446_v10 = vpop.f32.mrb[81].mxu0 }
 0x198   :  { %518 = vrot.lane.b32.xlu1 %v3226_v16, %s2745_s10  ;;  %526 = vrot.lane.b32.xlu0 %v3261_v62, %s2745_s10 }
 0x199   :  { %v475_v11 = vpop.permute.xlu0 %474 }
 0x19a   :  { %v3279_v17 = vpop.f32.mrb[82].mxu0  ;;  %v3325_v3 = vmax.f32 %v3132_v36, %v475_v11 }
 0x19b   :  { %v2449_v19 = vpop.f32.mrb[83].mxu0 }
 0x19c   :  { %520 = vrot.lane.b32.xlu1 %v3233_v43, %s2745_s10  ;;  %528 = vrot.lane.b32.xlu0 %v3267_v20, %s2745_s10 }
 0x19d   :  { %v477_v27 = vpop.permute.xlu0 %476 }
 0x19e   :  { %v3289_v33 = vmax.f32 %v3138_v38, %v477_v27  ;;  %v3291_v37 = vpop.f32.mrb[84].mxu0  ;;  %v473_v38 = vpop.permute.xlu1 %472 }
 0x19f   :  { %v2452_v39 = vpop.f32.mrb[85].mxu0  ;;  %v3310_v57 = vmax.f32 %v3128_v34, %v473_v38 }
 0x1a0   :  { %713 = vrot.lane.b32.xlu1 %v3286_v31, %s2746_s0  ;;  %721 = vrot.lane.b32.xlu0 %v3289_v33, %s2746_s0 }
 0x1a1   :  { %v479_v45 = vpop.permute.xlu0 %478 }
 0x1a2   :  { %v3301_v49 = vmax.f32 %v3142_v40, %v479_v45  ;;  %v3303_v30 = vpop.f32.mrb[86].mxu0 }
 0x1a3   :  { %v2455_v55 = vpop.f32.mrb[87].mxu0 }
 0x1a4   :  { %715 = vrot.lane.b32.xlu1 %v3298_v47, %s2746_s0  ;;  %723 = vrot.lane.b32.xlu0 %v3301_v49, %s2746_s0 }
 0x1a5   :  { %v481_v24 = vpop.permute.xlu0 %480 }
 0x1a6   :  { %v3313_v32 = vmax.f32 %v3146_v42, %v481_v24  ;;  %v3315_v26 = vpop.f32.mrb[88].mxu0 }
 0x1a7   :  { %v2458_v40 = vpop.f32.mrb[89].mxu0 }
 0x1a8   :  { %717 = vrot.lane.b32.xlu1 %v3310_v57, %s2746_s0  ;;  %725 = vrot.lane.b32.xlu0 %v3313_v32, %s2746_s0 }
 0x1aa   :  { %v3327_v34 = vpop.f32.mrb[90].mxu0 }
 0x1ab   :  { %v2461_v8 = vpop.f32.mrb[91].mxu0 }
 0x1ac   :  { %711 = vrot.lane.b32.xlu1 %v3322_v1, %s2746_s0  ;;  %719 = vrot.lane.b32.xlu0 %v3325_v3, %s2746_s0 }
 0x1ad   :  { %v485_v42 = vpop.permute.xlu1 %484 }
 0x1ae   :  { %v3333_v10 = vpop.f32.mrb[92].mxu0  ;;  %v3340_v36 = vmax.f32 %v3152_v46, %v485_v42 }
 0x1af   :  { %v2464_v19 = vpop.f32.mrb[93].mxu0 }
 0x1b0   :  { %498 = vrot.lane.b32.xlu1 %v3181_v61, %s2745_s10  ;;  %506 = vrot.lane.b32.xlu0 %v3195_v7, %s2745_s10 }
 0x1b1   :  { %v487_v28 = vpop.permute.xlu1 %486 }
 0x1b2   :  { %v3342_v12 = vpop.f32.mrb[94].mxu0  ;;  %v3347_v14 = vmax.f32 %v3156_v48, %v487_v28 }
 0x1b3   :  { %v2467_v11 = vpop.f32.mrb[95].mxu0 }
 0x1b4   :  { %729 = vrot.lane.b32.xlu0 %v3340_v36, %s2746_s0  ;;  %v1222_v11 = vld [vmem:[%s4406_s3 + $0x80] sm:$0xff] }
 0x1b5   :  { %v489_v27 = vpop.permute.xlu1 %488 }
 0x1b6   :  { %v3352_v39 = vmax.f32 %v3160_v50, %v489_v27  ;;  %v1223_v27 = vld [vmem:[%s4406_s3 + $0x88] sm:$0xff] }
 0x1b8   :  { %731 = vrot.lane.b32.xlu0 %v3347_v14, %s2746_s0 }
 0x1bc   :  { %733 = vrot.lane.b32.xlu0 %v3352_v39, %s2746_s0 }
 0x1bd   :  { %v493_v46 = vpop.permute.xlu0 %492 }
 0x1be   :  { %v3357_v45 = vmax.f32 %v3166_v54, %v493_v46 }
 0x1c0   :  { %737 = vrot.lane.b32.xlu0 %v3357_v45, %s2746_s0 }
 0x1c1   :  { %v495_v38 = vpop.permute.xlu0 %494 }
 0x1c2   :  { %v3362_v48 = vmax.f32 %v3170_v56, %v495_v38  ;;  %v3376_v56 = vld [vmem:[%s4405_s2] ss:$0 sm:$0xff] }
 0x1c4   :  { %739 = vrot.lane.b32.xlu1 %v3362_v48, %s2746_s0 }
 0x1c5   :  { %v497_v55 = vpop.permute.xlu0 %496 }
 0x1c6   :  { %v3367_v50 = vmax.f32 %v3174_v58, %v497_v55  ;;  %v2525_v55 = vpack.c.bf16 %v1223_v27, %v1222_v11  ;;  %v1209_v27 = vld [vmem:[%s4406_s3 + $0x18] sm:$0xff] }
 0x1c8   :  { %741 = vrot.lane.b32.xlu1 %v3367_v50, %s2746_s0  ;;  %2526 = vmatprep.subr.bf16.mxu1 %v2525_v55  ;;  %v1227_v55 = vld [vmem:[%s4406_s3 + $0xa8] sm:$0xff] }
 0x1cd   :  { %v501_v24 = vpop.permute.xlu1 %500 }
 0x1d1   :  { %v503_v54 = vpop.permute.xlu1 %502 }
 0x1d5   :  { %v3371_v40 = vpop.permute.xlu1 %504 }
 0x1dd   :  { %v509_v8 = vpop.permute.xlu0 %508 }
 0x1e2   :  { %v698_v42 = vpop.permute.xlu1 %697 }
 0x1e3   :  { %v843_v19 = vmax.f32 %v3202_v13, %v698_v42  ;;  %v1207_v13 = vld [vmem:[%s4406_s3 + $0x8] sm:$0xff]  ;;  %v3393_v42 = vpop.permute.xlu0 %510 }
 0x1e5   :  { %v899_v28 = vadd.f32 %v3376_v56, %v843_v19  ;;  %v2527_v19 = vpack.c.bf16 %v1207_v13, %v1206_v4  ;;  %v1208_v4 = vld [vmem:[%s4406_s3 + $0x10] sm:$0xff]  ;;  %v3419_v13 = vmax.f32 %v3197_v9, %v509_v8  ;;  %v1229_v8 = vld [vmem:[%s4406_s3 + $0xb8] sm:$0xff] }
 0x1e6   :  { %v700_v58 = vpop.permute.xlu1 %699  ;;  %v1228_v9 = vld [vmem:[%s4406_s3 + $0xb0] sm:$0xff] }
 0x1e7   :  { %v844_v46 = vmax.f32 %v3211_v21, %v700_v58  ;;  %v948_v38 = vmax.f32 %v899_v28, 0.0  ;;  %2528 = vmatpush3.bf16.msra.mxu1 %v2527_v19  ;;  %v1224_v21 = vld [vmem:[%s4406_s3 + $0x90] sm:$0xff]  ;;  %v1225_v28 = vld [vmem:[%s4406_s3 + $0x98] sm:$0xff] }
 0x1e8   :  { %v2529_v11 = vpack.c.bf16 %v1225_v28, %v1224_v21  ;;  %v1210_v21 = vld [vmem:[%s4406_s3 + $0x20] sm:$0xff]  ;;  %v1211_v28 = vld [vmem:[%s4406_s3 + $0x28] sm:$0xff] }
 0x1e9   :  { %v900_v0 = vadd.f32 %v3376_v56, %v844_v46  ;;  %999 = vrot.lane.b32.xlu0 %v948_v38, %s2747_s22  ;;  %v2531_v46 = vpack.c.bf16 %v1209_v27, %v1208_v4  ;;  %v3410_v38 = vpop.permute.xlu0 %512  ;;  %v3436_v4 = vmax.f32 %v3183_v63, %v501_v24  ;;  %v2537_v27 = vpack.c.bf16 %v1229_v8, %v1228_v9  ;;  %v1230_v63 = vld [vmem:[%s4406_s3 + $0xc0] sm:$0xff]  ;;  %v1231_v24 = vld [vmem:[%s4406_s3 + $0xc8] sm:$0xff] }
 0x1ea   :  { %2530 = vmatprep.subr.bf16.mxu1 %v2529_v11  ;;  %v1215_v9 = vld [vmem:[%s4406_s3 + $0x48] sm:$0xff] }
 0x1eb   :  { %v949_v58 = vmax.f32 %v900_v0, 0.0  ;;  %2532 = vmatpush3.bf16.msra.mxu1 %v2531_v46  ;;  %v1226_v0 = vld [vmem:[%s4406_s3 + $0xa0] sm:$0xff]  ;;  %v1212_v46 = vld [vmem:[%s4406_s3 + $0x30] sm:$0xff] }
 0x1ec   :  { %v2533_v19 = vpack.c.bf16 %v1227_v55, %v1226_v0  ;;  %v1213_v0 = vld [vmem:[%s4406_s3 + $0x38] sm:$0xff] }
 0x1ed   :  { %1005 = vrot.lane.b32.xlu0 %v949_v58, %s2746_s0  ;;  %v2535_v58 = vpack.c.bf16 %v1211_v28, %v1210_v21  ;;  %v2539_v55 = vpack.c.bf16 %v1213_v0, %v1212_v46  ;;  %v3453_v21 = vmax.f32 %v3187_v2, %v503_v54  ;;  %v2541_v28 = vpack.c.bf16 %v1231_v24, %v1230_v63  ;;  %v1232_v2 = vld [vmem:[%s4406_s3 + $0xd0] sm:$0xff]  ;;  %v1233_v54 = vld [vmem:[%s4406_s3 + $0xd8] sm:$0xff] }
 0x1ee   :  { %2534 = vmatprep.subr.bf16.mxu1 %v2533_v19  ;;  %v2545_v24 = vpack.c.bf16 %v1233_v54, %v1232_v2 }
 0x1ef   :  { %2536 = vmatpush3.bf16.msra.mxu1 %v2535_v58  ;;  %v1214_v58 = vld [vmem:[%s4406_s3 + $0x40] sm:$0xff] }
 0x1f0   :  { %2538 = vmatprep.subr.bf16.mxu1 %v2537_v27  ;;  %v2543_v8 = vpack.c.bf16 %v1215_v9, %v1214_v58  ;;  %v1234_v9 = vld [vmem:[%s4406_s3 + $0xe0] sm:$0xff] }
 0x1f1   :  { %753 = vrot.lane.b32.xlu0 %v3419_v13, %s2746_s0 }
 0x1f2   :  { %v706_v11 = vpop.permute.xlu0 %705 }
 0x1f3   :  { %2540 = vmatpush3.bf16.msra.mxu1 %v2539_v55  ;;  %v847_v27 = vmax.f32 %v3224_v35, %v706_v11  ;;  %v3472_v55 = vmax.f32 %v3191_v5, %v3371_v40  ;;  %v1216_v35 = vld [vmem:[%s4406_s3 + $0x50] sm:$0xff]  ;;  %v1217_v11 = vld [vmem:[%s4406_s3 + $0x58] sm:$0xff] }
 0x1f4   :  { %2542 = vmatprep.subr.bf16.mxu1 %v2541_v28  ;;  %v2547_v28 = vpack.c.bf16 %v1217_v11, %v1216_v35 }
 0x1f5   :  { %745 = vrot.lane.b32.xlu0 %v3436_v4, %s2746_s0  ;;  %4416 = vst [vmem:[#allocation3_spill] sm:$0xff] %v3472_v55  ;;  %v903_v5 = vadd.f32 %v3376_v56, %v847_v27  ;;  %v1218_v27 = vld [vmem:[%s4406_s3 + $0x60] sm:$0xff] }
 0x1f6   :  { %v708_v19 = vpop.permute.xlu0 %707 }
 0x1f7   :  { %2544 = vmatpush3.bf16.msra.mxu1 %v2543_v8  ;;  %v1235_v8 = vld [vmem:[%s4406_s3 + $0xe8] sm:$0xff] }
 0x1f8   :  { %2546 = vmatprep.subr.bf16.mxu1 %v2545_v24  ;;  %v1219_v24 = vld [vmem:[%s4406_s3 + $0x68] sm:$0xff]  ;;  %v2549_v35 = vpack.c.bf16 %v1235_v8, %v1234_v9 }
 0x1f9   :  { %747 = vrot.lane.b32.xlu0 %v3453_v21, %s2746_s0  ;;  %v2551_v11 = vpack.c.bf16 %v1219_v24, %v1218_v27 }
 0x1fa   :  { %v702_v46 = vpop.permute.xlu1 %701  ;;  %v710_v0 = vpop.permute.xlu0 %709 }
 0x1fb   :  { %v845_v63 = vmax.f32 %v3238_v22, %v702_v46  ;;  %2548 = vmatpush3.bf16.msra.mxu1 %v2547_v28  ;;  %v848_v46 = vmax.f32 %v3231_v41, %v708_v19  ;;  %v1236_v19 = vld [vmem:[%s4406_s3 + $0xf0] sm:$0xff] }
 0x1fc   :  { %2550 = vmatprep.subr.bf16.mxu1 %v2549_v35 }
 0x1fd   :  { %v901_v58 = vadd.f32 %v3376_v56, %v845_v63  ;;  %749 = vrot.lane.b32.xlu0 %v3472_v55, %s2746_s0 }
 0x1fe   :  { %v696_v40 = vpop.permute.xlu1 %695  ;;  %v704_v22 = vpop.permute.xlu0 %703 }
 0x1ff   :  { %v842_v2 = vmax.f32 %v3250_v59, %v696_v40  ;;  %v846_v54 = vmax.f32 %v3253_v18, %v704_v22  ;;  %v950_v63 = vmax.f32 %v901_v58, 0.0  ;;  %v952_v18 = vmax.f32 %v903_v5, 0.0  ;;  %v1237_v58 = vld [vmem:[%s4406_s3 + $0xf8] sm:$0xff]  ;;  %2552 = vmatpush3.bf16.msra.mxu1 %v2551_v11  ;;  %v1220_v5 = vld [vmem:[%s4406_s3 + $0x70] sm:$0xff] }
 0x200   :  { %v904_v40 = vadd.f32 %v3376_v56, %v848_v46  ;;  %v849_v22 = vmax.f32 %v3241_v51, %v710_v0  ;;  %v1255_v46 = vld [vmem:[%s4406_s3 + $0x188] sm:$0xff] }
 0x201   :  { %v898_v28 = vadd.f32 %v3376_v56, %v842_v2  ;;  %v902_v55 = vadd.f32 %v3376_v56, %v846_v54  ;;  %1011 = vrot.lane.b32.xlu1 %v950_v63, %s2745_s10  ;;  %540 = vrot.lane.b32.xlu0 %v3327_v34, %s2745_s10  ;;  %v1221_v2 = vld [vmem:[%s4406_s3 + $0x78] sm:$0xff]  ;;  %v2553_v54 = vpack.c.bf16 %v1237_v58, %v1236_v19 }
 0x202   :  { %v3505_v41 = vpop.permute.xlu1 %482  ;;  %v3507_v59 = vpop.permute.xlu0 %490  ;;  %v2555_v63 = vpack.c.bf16 %v1221_v2, %v1220_v5  ;;  %v905_v27 = vadd.f32 %v3376_v56, %v849_v22  ;;  %v953_v24 = vmax.f32 %v904_v40, 0.0  ;;  %v3551_v22 = vmax.f32 %v3204_v15, %v3393_v42 }
 0x203   :  { %v947_v9 = vmax.f32 %v898_v28, 0.0  ;;  %v951_v8 = vmax.f32 %v902_v55, 0.0  ;;  %2554 = vmatprep.subr.bf16.mxu1 %v2553_v54  ;;  %v1254_v55 = vld [vmem:[%s4406_s3 + $0x180] sm:$0xff] }
 0x204   :  { %2556 = vmatpush3.bf16.msra.mxu1 %v2555_v63  ;;  %v2557_v35 = vpack.c.bf16 %v1255_v46, %v1254_v55 }
 0x205   :  { %1018 = vrot.lane.b32.xlu1 %v952_v18, %s2747_s22  ;;  %542 = vrot.lane.b32.xlu0 %v3333_v10, %s2745_s10  ;;  %997 = vst.msk [vmem:[#allocation2] sm:$0xff] %vm996_vm1, %v947_v9  ;;  %1016 = vst.msk [vmem:[#allocation2 + $0x8] sm:$0xff] %vm996_vm1, %v951_v8  ;;  %v954_v18 = vmax.f32 %v905_v27, 0.0  ;;  %v3557_v8 = vmax.f32 %v3213_v23, %v3410_v38 }
 0x206   :  { %v3528_v51 = vpop.permute.xlu1 %516  ;;  %v3530_v0 = vpop.permute.xlu0 %524  ;;  %2558 = vmatprep.subr.bf16.mxu1 %v2557_v35 }
 0x209   :  { %1023 = vrot.lane.b32.xlu1 %v953_v24, %s2746_s0 }
 0x20a   :  { %v3540_v11 = vpop.permute.xlu1 %518  ;;  %v3542_v28 = vpop.permute.xlu0 %526 }
 0x20d   :  { %1028 = vrot.lane.b32.xlu1 %v954_v18, %s2745_s10 }
 0x20e   :  { %v3545_v19 = vpop.permute.xlu1 %520  ;;  %v3547_v58 = vpop.permute.xlu0 %528 }
 0x211   :  { %755 = vrot.lane.b32.xlu1 %v3551_v22, %s2746_s0 }
 0x212   :  { %v714_v40 = vpop.permute.xlu1 %713  ;;  %v722_v9 = vpop.permute.xlu0 %721 }
 0x213   :  { %v851_v5 = vmax.f32 %v3286_v31, %v714_v40  ;;  %v855_v23 = vmax.f32 %v3289_v33, %v722_v9 }
 0x215   :  { %v907_v2 = vadd.f32 %v3376_v56, %v851_v5  ;;  %757 = vrot.lane.b32.xlu1 %v3557_v8, %s2746_s0 }
 0x216   :  { %v716_v54 = vpop.permute.xlu1 %715  ;;  %v724_v63 = vpop.permute.xlu0 %723 }
 0x217   :  { %v956_v15 = vmax.f32 %v907_v2, 0.0  ;;  %v852_v42 = vmax.f32 %v3298_v47, %v716_v54  ;;  %v911_v47 = vadd.f32 %v3376_v56, %v855_v23  ;;  %v856_v40 = vmax.f32 %v3301_v49, %v724_v63 }
 0x218   :  { %v3585_v54 = vmax.f32 %v3164_v52, %v3507_v59  ;;  %v3602_v23 = vmax.f32 %v3255_v60, %v3530_v0  ;;  %v3618_v0 = vmax.f32 %v3150_v44, %v3505_v41 }
 0x219   :  { %v908_v55 = vadd.f32 %v3376_v56, %v852_v42  ;;  %532 = vrot.lane.b32.xlu1 %v3279_v17, %s2745_s10  ;;  %1034 = vrot.lane.b32.xlu0 %v956_v15, %s2747_s22  ;;  %v960_v15 = vmax.f32 %v911_v47, 0.0  ;;  %v912_v63 = vadd.f32 %v3376_v56, %v856_v40  ;;  %v3622_v47 = vmax.f32 %v3226_v16, %v3540_v11 }
 0x21a   :  { %v718_v31 = vpop.permute.xlu1 %717  ;;  %v726_v38 = vpop.permute.xlu0 %725  ;;  %v3644_v40 = vmax.f32 %v3233_v43, %v3545_v19 }
 0x21b   :  { %v957_v46 = vmax.f32 %v908_v55, 0.0  ;;  %v853_v27 = vmax.f32 %v3310_v57, %v718_v31  ;;  %v961_v52 = vmax.f32 %v912_v63, 0.0 }
 0x21d   :  { %v909_v24 = vadd.f32 %v3376_v56, %v853_v27  ;;  %534 = vrot.lane.b32.xlu1 %v3291_v37, %s2745_s10  ;;  %1039 = vrot.lane.b32.xlu0 %v957_v46, %s2746_s0  ;;  %v3609_v27 = vmax.f32 %v3221_v29, %v3528_v51 }
 0x21e   :  { %v712_v35 = vpop.permute.xlu1 %711  ;;  %v720_v18 = vpop.permute.xlu0 %719 }
 0x21f   :  { %v958_v5 = vmax.f32 %v909_v24, 0.0  ;;  %v850_v33 = vmax.f32 %v3322_v1, %v712_v35  ;;  %v854_v9 = vmax.f32 %v3325_v3, %v720_v18  ;;  %v857_v1 = vmax.f32 %v3313_v32, %v726_v38  ;;  %v3598_v32 = vpop.f32.mrb[96].mxu0 }
 0x220   :  { %v2470_v38 = vpop.f32.mrb[97].mxu0 }
 0x221   :  { %v906_v57 = vadd.f32 %v3376_v56, %v850_v33  ;;  %v910_v2 = vadd.f32 %v3376_v56, %v854_v9  ;;  %1044 = vrot.lane.b32.xlu1 %v958_v5, %s2745_s10  ;;  %544 = vrot.lane.b32.xlu0 %v3342_v12, %s2745_s10  ;;  %v913_v59 = vadd.f32 %v3376_v56, %v857_v1 }
 0x222   :  { %v507_v49 = vpop.permute.xlu0 %506  ;;  %v3648_v5 = vmax.f32 %v3267_v20, %v3547_v58 }
 0x223   :  { %v955_v3 = vmax.f32 %v906_v57, 0.0  ;;  %v959_v42 = vmax.f32 %v910_v2, 0.0  ;;  %v962_v31 = vmax.f32 %v913_v59, 0.0 }
 0x225   :  { %1050 = vrot.lane.b32.xlu1 %v960_v15, %s2747_s22  ;;  %735 = vrot.lane.b32.xlu0 %v3585_v54, %s2746_s0  ;;  %1032 = vst.msk [vmem:[#allocation2 + $0x10] sm:$0xff] %vm996_vm1, %v955_v3  ;;  %1048 = vst.msk [vmem:[#allocation2 + $0x18] sm:$0xff] %vm996_vm1, %v959_v42 }
 0x226   :  { %v730_v55 = vpop.permute.xlu0 %729 }
 0x227   :  { %v859_v24 = vmax.f32 %v3340_v36, %v730_v55  ;;  %v499_v36 = vpop.permute.xlu1 %498 }
 0x228   :  { %v3673_v2 = vmax.f32 %v3181_v61, %v499_v36 }
 0x229   :  { %1055 = vrot.lane.b32.xlu1 %v961_v52, %s2746_s0  ;;  %522 = vrot.lane.b32.xlu0 %v3243_v53, %s2745_s10  ;;  %v915_v29 = vadd.f32 %v3376_v56, %v859_v24  ;;  %v1238_v24 = vld [vmem:[%s4406_s3 + $0x100] sm:$0xff] }
 0x22a   :  { %v732_v46 = vpop.permute.xlu0 %731 }
 0x22b   :  { %v860_v51 = vmax.f32 %v3347_v14, %v732_v46  ;;  %v964_v35 = vmax.f32 %v915_v29, 0.0  ;;  %v3636_v14 = vmax.f32 %v3261_v62, %v3542_v28  ;;  %v1257_v29 = vld [vmem:[%s4406_s3 + $0x198] sm:$0xff] }
 0x22d   :  { %1060 = vrot.lane.b32.xlu1 %v962_v31, %s2745_s10  ;;  %769 = vrot.lane.b32.xlu0 %v3602_v23, %s2746_s0  ;;  %v916_v18 = vadd.f32 %v3376_v56, %v860_v51 }
 0x22e   :  { %v734_v60 = vpop.permute.xlu0 %733 }
 0x22f   :  { %v965_v41 = vmax.f32 %v916_v18, 0.0 }
 0x231   :  { %536 = vrot.lane.b32.xlu1 %v3303_v30, %s2745_s10  ;;  %761 = vrot.lane.b32.xlu0 %v3609_v27, %s2746_s0 }
 0x232   :  { %v738_v44 = vpop.permute.xlu0 %737 }
 0x233   :  { %v863_v11 = vmax.f32 %v3357_v45, %v738_v44  ;;  %v3657_v45 = vmax.f32 %v3195_v7, %v507_v49  ;;  %v1240_v44 = vld [vmem:[%s4406_s3 + $0x110] sm:$0xff] }
 0x235   :  { %727 = vrot.lane.b32.xlu1 %v3618_v0, %s2746_s0  ;;  %763 = vrot.lane.b32.xlu0 %v3622_v47, %s2746_s0  ;;  %v919_v33 = vadd.f32 %v3376_v56, %v863_v11  ;;  %v1258_v11 = vld [vmem:[%s4406_s3 + $0x1a0] sm:$0xff] }
 0x236   :  { %v740_v16 = vpop.permute.xlu1 %739 }
 0x237   :  { %v864_v62 = vmax.f32 %v3362_v48, %v740_v16  ;;  %v968_v43 = vmax.f32 %v919_v33, 0.0  ;;  %v861_v48 = vmax.f32 %v3352_v39, %v734_v60  ;;  %v1256_v60 = vld [vmem:[%s4406_s3 + $0x190] sm:$0xff]  ;;  %v1241_v16 = vld [vmem:[%s4406_s3 + $0x118] sm:$0xff]  ;;  %v1259_v33 = vld [vmem:[%s4406_s3 + $0x1a8] sm:$0xff] }
 0x238   :  { %v2561_v18 = vpack.c.bf16 %v1257_v29, %v1256_v60  ;;  %v1247_v60 = vld [vmem:[%s4406_s3 + $0x148] sm:$0xff] }
 0x239   :  { %514 = vrot.lane.b32.xlu1 %v3219_v25, %s2745_s10  ;;  %1066 = vrot.lane.b32.xlu0 %v964_v35, %s2747_s22  ;;  %v920_v19 = vadd.f32 %v3376_v56, %v864_v62  ;;  %v917_v7 = vadd.f32 %v3376_v56, %v861_v48  ;;  %v2563_v62 = vpack.c.bf16 %v1241_v16, %v1240_v44  ;;  %v1243_v48 = vld [vmem:[%s4406_s3 + $0x128] sm:$0xff] }
 0x23a   :  { %v742_v28 = vpop.permute.xlu1 %741 }
 0x23b   :  { %v865_v20 = vmax.f32 %v3367_v50, %v742_v28  ;;  %v969_v58 = vmax.f32 %v920_v19, 0.0  ;;  %v966_v50 = vmax.f32 %v917_v7, 0.0  ;;  %v2565_v19 = vpack.c.bf16 %v1259_v33, %v1258_v11  ;;  %v1260_v7 = vld [vmem:[%s4406_s3 + $0x1b0] sm:$0xff] }
 0x23c   :  { %v1248_v33 = vld [vmem:[%s4406_s3 + $0x150] sm:$0xff] }
 0x23d   :  { %771 = vrot.lane.b32.xlu1 %v3636_v14, %s2746_s0  ;;  %1071 = vrot.lane.b32.xlu0 %v965_v41, %s2746_s0  ;;  %v921_v9 = vadd.f32 %v3376_v56, %v865_v20  ;;  %v1242_v20 = vld [vmem:[%s4406_s3 + $0x120] sm:$0xff] }
 0x23f   :  { %v970_v57 = vmax.f32 %v921_v9, 0.0 }
 0x241   :  { %773 = vrot.lane.b32.xlu1 %v3648_v5, %s2746_s0  ;;  %765 = vrot.lane.b32.xlu0 %v3644_v40, %s2746_s0 }
 0x245   :  { %1082 = vrot.lane.b32.xlu1 %v968_v43, %s2747_s22  ;;  %751 = vrot.lane.b32.xlu0 %v3657_v45, %s2746_s0 }
 0x249   :  { %1087 = vrot.lane.b32.xlu1 %v969_v58, %s2746_s0  ;;  %538 = vrot.lane.b32.xlu0 %v3315_v26, %s2745_s10 }
 0x24d   :  { %1092 = vrot.lane.b32.xlu1 %v970_v57, %s2745_s10  ;;  %v1261_v57 = vld [vmem:[%s4406_s3 + $0x1b8] sm:$0xff] }
 0x251   :  { %1076 = vrot.lane.b32.xlu1 %v966_v50, %s2745_s10  ;;  %v2567_v50 = vpack.c.bf16 %v1243_v48, %v1242_v20 }
 0x255   :  { %743 = vrot.lane.b32.xlu1 %v3673_v2, %s2746_s0 }
 0x259   :  { %530 = vrot.lane.b32.xlu1 %v3273_v6, %s2745_s10 }
 0x25b   :  { %v1000_v39 = vpop.permute.xlu0 %999 }
 0x25c   :  { %1003 = vst.msk [vmem:[#allocation2] sm:$0xff] %vm1002_vm2, %v1000_v39 }
 0x25f   :  { %v1006_v15 = vpop.permute.xlu0 %1005 }
 0x260   :  { %1009 = vst.msk [vmem:[#allocation2] sm:$0xff] %vm1008_vm3, %v1006_v15  ;;  %v1244_v15 = vld [vmem:[%s4406_s3 + $0x130] sm:$0xff] }
 0x263   :  { %v3681_v49 = vpop.permute.xlu0 %753 }
 0x267   :  { %v746_v63 = vpop.permute.xlu0 %745 }
 0x268   :  { %v867_v58 = vmax.f32 %v3436_v4, %v746_v63  ;;  %v1245_v63 = vld [vmem:[%s4406_s3 + $0x138] sm:$0xff] }
 0x26b   :  { %v3683_v1 = vpop.permute.xlu0 %747 }
 0x26f   :  { %v3685_v61 = vpop.permute.xlu0 %749 }
 0x273   :  { %v1012_v3 = vpop.permute.xlu1 %1011  ;;  %v541_v42 = vpop.permute.xlu0 %540 }
 0x274   :  { %1015 = vst.msk [vmem:[#allocation2] sm:$0xff] %vm1014_vm4, %v1012_v3  ;;  %v3689_v55 = vmax.f32 %v3327_v34, %v541_v42  ;;  %v923_v3 = vadd.f32 %v3376_v56, %v867_v58  ;;  %v868_v42 = vmax.f32 %v3453_v21, %v3683_v1  ;;  %v2571_v21 = vpack.c.bf16 %v1245_v63, %v1244_v15  ;;  %v4417_v15 = vld [vmem:[#allocation3_spill] sm:$0xff] }
 0x275   :  { %v869_v63 = vmax.f32 %v4417_v15, %v3685_v61  ;;  %v1253_v61 = vld [vmem:[%s4406_s3 + $0x178] sm:$0xff] }
 0x276   :  { %785 = vrot.lane.b32.xlu0 %v3689_v55, %s2746_s0  ;;  %v972_v29 = vmax.f32 %v923_v3, 0.0 }
 0x277   :  { %v1019_v52 = vpop.permute.xlu1 %1018  ;;  %v543_v59 = vpop.permute.xlu0 %542 }
 0x278   :  { %1021 = vst.msk [vmem:[#allocation2 + $0x8] sm:$0xff] %vm1002_vm2, %v1019_v52  ;;  %v3695_v31 = vmax.f32 %v3333_v10, %v543_v59  ;;  %v1239_v10 = vld [vmem:[%s4406_s3 + $0x108] sm:$0xff]  ;;  %v1262_v59 = vld [vmem:[%s4406_s3 + $0x1c0] sm:$0xff] }
 0x279   :  { %v2559_v51 = vpack.c.bf16 %v1239_v10, %v1238_v24  ;;  %v1246_v10 = vld [vmem:[%s4406_s3 + $0x140] sm:$0xff] }
 0x27a   :  { %787 = vrot.lane.b32.xlu1 %v3695_v31, %s2746_s0  ;;  %v2575_v16 = vpack.c.bf16 %v1247_v60, %v1246_v10  ;;  %v925_v10 = vadd.f32 %v3376_v56, %v869_v63 }
 0x27b   :  { %v1024_v38 = vpop.permute.xlu1 %1023  ;;  %v1193_v41 = vld [vmem:[#allocation2] sm:$0xff] }
 0x27c   :  { %1026 = vst.msk [vmem:[#allocation2 + $0x8] sm:$0xff] %vm1008_vm3, %v1024_v38  ;;  %v1263_v38 = vld [vmem:[%s4406_s3 + $0x1c8] sm:$0xff] }
 0x27d   :  { %v2573_v24 = vpack.c.bf16 %v1263_v38, %v1262_v59 }
 0x27f   :  { %v1029_v46 = vpop.permute.xlu1 %1028 }
 0x280   :  { %1031 = vst.msk [vmem:[#allocation2 + $0x8] sm:$0xff] %vm1014_vm4, %v1029_v46  ;;  %v871_v46 = vmax.f32 %v3419_v13, %v3681_v49  ;;  %v924_v13 = vadd.f32 %v3376_v56, %v868_v42 }
 0x283   :  { %v3701_v34 = vpop.permute.xlu1 %755 }
 0x284   :  { %v872_v44 = vmax.f32 %v3551_v22, %v3701_v34  ;;  %v973_v22 = vmax.f32 %v924_v13, 0.0 }
 0x286   :  { %v928_v20 = vadd.f32 %v3376_v56, %v872_v44  ;;  %v1271_v44 = vld [vmem:[%s4406_s3 + $0x208] sm:$0xff] }
 0x287   :  { %v3715_v36 = vpop.permute.xlu1 %757  ;;  %v1194_v35 = vld [vmem:[#allocation2 + $0x8] sm:$0xff] }
 0x288   :  { %1476 = vmatprep.mubr.f32.mxu1 %v1194_v35  ;;  %v1265_v35 = vld [vmem:[%s4406_s3 + $0x1d8] sm:$0xff]  ;;  %v873_v48 = vmax.f32 %v3557_v8, %v3715_v36  ;;  %v1251_v8 = vld [vmem:[%s4406_s3 + $0x168] sm:$0xff]  ;;  %v977_v3 = vmax.f32 %v928_v20, 0.0 }
 0x289   :  { %1477 = vmatmul.mubr.f32.vlgmr.msra.gmra.mrb[0].mxu1 %v1193_v41 }
 0x28a   :  { %2560 = vmatpush3.bf16.msra.mxu1 %v2559_v51  ;;  %v1264_v51 = vld [vmem:[%s4406_s3 + $0x1d0] sm:$0xff]  ;;  %v929_v42 = vadd.f32 %v3376_v56, %v873_v48 }
 0x28b   :  { %v533_v28 = vpop.permute.xlu1 %532  ;;  %v1035_v43 = vpop.permute.xlu0 %1034  ;;  %2562 = vmatprep.subr.bf16.mxu1 %v2561_v18  ;;  %v927_v18 = vadd.f32 %v3376_v56, %v871_v46  ;;  %v2577_v11 = vpack.c.bf16 %v1265_v35, %v1264_v51 }
 0x28c   :  { %v3737_v9 = vmax.f32 %v3279_v17, %v533_v28  ;;  %1037 = vst.msk [vmem:[#allocation2 + $0x10] sm:$0xff] %vm1002_vm2, %v1035_v43  ;;  %v2569_v17 = vpack.c.bf16 %v1261_v57, %v1260_v7  ;;  %v1266_v28 = vld [vmem:[%s4406_s3 + $0x1e0] sm:$0xff]  ;;  %v1267_v43 = vld [vmem:[%s4406_s3 + $0x1e8] sm:$0xff]  ;;  %v978_v60 = vmax.f32 %v929_v42, 0.0  ;;  %v1293_v42 = vld [vmem:[%s4406_s3 + $0x2b8] sm:$0xff] }
 0x28e   :  { %2564 = vmatpush3.bf16.msra.mxu1 %v2563_v62  ;;  %777 = vrot.lane.b32.xlu0 %v3737_v9, %s2746_s0  ;;  %v1249_v62 = vld [vmem:[%s4406_s3 + $0x158] sm:$0xff] }
 0x28f   :  { %v535_v39 = vpop.permute.xlu1 %534  ;;  %v1040_v4 = vpop.permute.xlu0 %1039  ;;  %2566 = vmatprep.subr.bf16.mxu1 %v2565_v19  ;;  %v976_v19 = vmax.f32 %v927_v18, 0.0  ;;  %v1270_v18 = vld [vmem:[%s4406_s3 + $0x200] sm:$0xff] }
 0x290   :  { %v3758_v52 = vmax.f32 %v3291_v37, %v535_v39  ;;  %1042 = vst.msk [vmem:[#allocation2 + $0x10] sm:$0xff] %vm1008_vm3, %v1040_v4  ;;  %v1250_v39 = vld [vmem:[%s4406_s3 + $0x160] sm:$0xff]  ;;  %v1268_v4 = vld [vmem:[%s4406_s3 + $0x1f0] sm:$0xff] }
 0x291   :  { %v2583_v59 = vpack.c.bf16 %v1251_v8, %v1250_v39 }
 0x292   :  { %2568 = vmatpush3.bf16.msra.mxu1 %v2567_v50  ;;  %779 = vrot.lane.b32.xlu0 %v3758_v52, %s2746_s0  ;;  %v2581_v50 = vpack.c.bf16 %v1267_v43, %v1266_v28  ;;  %v1272_v43 = vld [vmem:[%s4406_s3 + $0x210] sm:$0xff] }
 0x293   :  { %v1045_v37 = vpop.permute.xlu1 %1044  ;;  %v545_v1 = vpop.permute.xlu0 %544  ;;  %2570 = vmatprep.subr.bf16.mxu1 %v2569_v17  ;;  %v1269_v17 = vld [vmem:[%s4406_s3 + $0x1f8] sm:$0xff] }
 0x294   :  { %1047 = vst.msk [vmem:[#allocation2 + $0x10] sm:$0xff] %vm1014_vm4, %v1045_v37  ;;  %v3780_v49 = vmax.f32 %v3342_v12, %v545_v1  ;;  %v1252_v37 = vld [vmem:[%s4406_s3 + $0x170] sm:$0xff]  ;;  %v1286_v1 = vld [vmem:[%s4406_s3 + $0x280] sm:$0xff] }
 0x296   :  { %2572 = vmatpush3.bf16.msra.mxu1 %v2571_v21  ;;  %1098 = vrot.lane.b32.xlu0 %v972_v29, %s2747_s22  ;;  %v2585_v21 = vpack.c.bf16 %v1269_v17, %v1268_v4  ;;  %v2587_v29 = vpack.c.bf16 %v1253_v61, %v1252_v37 }
 0x297   :  { %789 = vrot.lane.b32.xlu1 %v3780_v49, %s2746_s0  ;;  %v1051_v12 = vpop.permute.xlu1 %1050  ;;  %v736_v41 = vpop.permute.xlu0 %735  ;;  %2574 = vmatprep.subr.bf16.mxu1 %v2573_v24  ;;  %v1287_v24 = vld [vmem:[%s4406_s3 + $0x288] sm:$0xff] }
 0x298   :  { %1053 = vst.msk [vmem:[#allocation2 + $0x18] sm:$0xff] %vm1002_vm2, %v1051_v12  ;;  %v862_v34 = vmax.f32 %v3585_v54, %v736_v41  ;;  %v2579_v54 = vpack.c.bf16 %v1249_v62, %v1248_v33  ;;  %v2589_v35 = vpack.c.bf16 %v1287_v24, %v1286_v1  ;;  %v1288_v12 = vld [vmem:[%s4406_s3 + $0x290] sm:$0xff]  ;;  %v1289_v41 = vld [vmem:[%s4406_s3 + $0x298] sm:$0xff]  ;;  %v2591_v62 = vpack.c.bf16 %v1271_v44, %v1270_v18 }
 0x299   :  { %v2593_v28 = vpack.c.bf16 %v1289_v41, %v1288_v12  ;;  %v1277_v24 = vld [vmem:[%s4406_s3 + $0x238] sm:$0xff] }
 0x29a   :  { %v918_v58 = vadd.f32 %v3376_v56, %v862_v34  ;;  %2576 = vmatpush3.bf16.msra.mxu1 %v2575_v16  ;;  %1103 = vrot.lane.b32.xlu0 %v973_v22, %s2746_s0 }
 0x29b   :  { %1114 = vrot.lane.b32.xlu1 %v976_v19, %s2747_s22  ;;  %v1056_v7 = vpop.permute.xlu1 %1055  ;;  %v523_v57 = vpop.permute.xlu0 %522  ;;  %2578 = vmatprep.subr.bf16.mxu1 %v2577_v11  ;;  %v974_v11 = vmax.f32 %v925_v10, 0.0  ;;  %v1195_v48 = vld [vmem:[#allocation2 + $0x10] sm:$0xff]  ;;  %v1294_v10 = vld [vmem:[%s4406_s3 + $0x2c0] sm:$0xff] }
 0x29c   :  { %v967_v36 = vmax.f32 %v918_v58, 0.0  ;;  %1058 = vst.msk [vmem:[#allocation2 + $0x18] sm:$0xff] %vm1008_vm3, %v1056_v7  ;;  %v1290_v58 = vld [vmem:[%s4406_s3 + $0x2a0] sm:$0xff]  ;;  %v3881_v7 = vmax.f32 %v3243_v53, %v523_v57  ;;  %v1275_v57 = vld [vmem:[%s4406_s3 + $0x228] sm:$0xff] }
 0x29d   :  { %v1274_v53 = vld [vmem:[%s4406_s3 + $0x220] sm:$0xff] }
 0x29e   :  { %1080 = vst.msk [vmem:[#allocation2 + $0x28] sm:$0xff] %vm996_vm1, %v967_v36  ;;  %2580 = vmatpush3.bf16.msra.mxu1 %v2579_v54  ;;  %v1291_v54 = vld [vmem:[%s4406_s3 + $0x2a8] sm:$0xff] }
 0x29f   :  { %1119 = vrot.lane.b32.xlu1 %v977_v3, %s2746_s0  ;;  %v1061_v38 = vpop.permute.xlu1 %1060  ;;  %v770_v46 = vpop.permute.xlu0 %769  ;;  %2582 = vmatprep.subr.bf16.mxu1 %v2581_v50  ;;  %v2597_v36 = vpack.c.bf16 %v1291_v54, %v1290_v58  ;;  %v1292_v3 = vld [vmem:[%s4406_s3 + $0x2b0] sm:$0xff]  ;;  %v1281_v58 = vld [vmem:[%s4406_s3 + $0x258] sm:$0xff]  ;;  %v1298_v54 = vld [vmem:[%s4406_s3 + $0x2e0] sm:$0xff] }
 0x2a0   :  { %1063 = vst.msk [vmem:[#allocation2 + $0x18] sm:$0xff] %vm1014_vm4, %v1061_v38  ;;  %v879_v33 = vmax.f32 %v3602_v23, %v770_v46  ;;  %v1273_v23 = vld [vmem:[%s4406_s3 + $0x218] sm:$0xff]  ;;  %v2599_v38 = vpack.c.bf16 %v1275_v57, %v1274_v53  ;;  %v2601_v46 = vpack.c.bf16 %v1293_v42, %v1292_v3  ;;  %v1283_v57 = vld [vmem:[%s4406_s3 + $0x268] sm:$0xff]  ;;  %v1284_v42 = vld [vmem:[%s4406_s3 + $0x270] sm:$0xff] }
 0x2a2   :  { %2584 = vmatpush3.bf16.msra.mxu1 %v2583_v59  ;;  %v935_v50 = vadd.f32 %v3376_v56, %v879_v33  ;;  %v1279_v33 = vld [vmem:[%s4406_s3 + $0x248] sm:$0xff] }
 0x2a3   :  { %1124 = vrot.lane.b32.xlu1 %v978_v60, %s2745_s10  ;;  %v537_v13 = vpop.permute.xlu1 %536  ;;  %v762_v51 = vpop.permute.xlu0 %761  ;;  %2586 = vmatprep.subr.bf16.mxu1 %v2585_v21  ;;  %v1276_v21 = vld [vmem:[%s4406_s3 + $0x230] sm:$0xff]  ;;  %v1295_v60 = vld [vmem:[%s4406_s3 + $0x2c8] sm:$0xff] }
 0x2a4   :  { %v3854_v16 = vmax.f32 %v3303_v30, %v537_v13  ;;  %v875_v19 = vmax.f32 %v3609_v27, %v762_v51  ;;  %v984_v59 = vmax.f32 %v935_v50, 0.0  ;;  %v2603_v51 = vpack.c.bf16 %v1277_v24, %v1276_v21  ;;  %v1299_v50 = vld [vmem:[%s4406_s3 + $0x2e8] sm:$0xff] }
 0x2a5   :  { %v2613_v53 = vpack.c.bf16 %v1299_v50, %v1298_v54  ;;  %v1310_v50 = vld [vmem:[%s4406_s3 + $0x340] sm:$0xff] }
 0x2a6   :  { %2588 = vmatpush3.bf16.msra.mxu1 %v2587_v29  ;;  %781 = vrot.lane.b32.xlu0 %v3854_v16, %s2746_s0  ;;  %v931_v4 = vadd.f32 %v3376_v56, %v875_v19 }
 0x2a7   :  { %1108 = vrot.lane.b32.xlu1 %v974_v11, %s2745_s10  ;;  %v728_v30 = vpop.permute.xlu1 %727  ;;  %v764_v22 = vpop.permute.xlu0 %763  ;;  %v1196_v34 = vld [vmem:[#allocation2 + $0x18] sm:$0xff]  ;;  %2590 = vmatprep.subr.bf16.mxu1 %v2589_v35  ;;  %v2605_v35 = vpack.c.bf16 %v1295_v60, %v1294_v10  ;;  %v1278_v11 = vld [vmem:[%s4406_s3 + $0x240] sm:$0xff]  ;;  %v1320_v10 = vld [vmem:[%s4406_s3 + $0x390] sm:$0xff] }
 0x2a8   :  { %v858_v20 = vmax.f32 %v3618_v0, %v728_v30  ;;  %1546 = vmatprep.mubr.f32.mxu1 %v1196_v34  ;;  %v2595_v0 = vpack.c.bf16 %v1273_v23, %v1272_v43  ;;  %v876_v15 = vmax.f32 %v3622_v47, %v764_v22  ;;  %v980_v37 = vmax.f32 %v931_v4, 0.0  ;;  %v1297_v30 = vld [vmem:[%s4406_s3 + $0x2d8] sm:$0xff]  ;;  %v1300_v4 = vld [vmem:[%s4406_s3 + $0x2f0] sm:$0xff] }
 0x2a9   :  { %1547 = vmatmul.mubr.f32.vlgmr.msra.gmra.mrb[2].mxu1 %v1195_v48  ;;  %v1280_v48 = vld [vmem:[%s4406_s3 + $0x250] sm:$0xff]  ;;  %v1321_v60 = vld [vmem:[%s4406_s3 + $0x398] sm:$0xff] }
 0x2aa   :  { %v914_v27 = vadd.f32 %v3376_v56, %v858_v20  ;;  %546 = vrot.lane.b32.xlu0 %v3598_v32, %s2745_s10  ;;  %2592 = vmatpush3.bf16.msra.mxu1 %v2591_v62  ;;  %v932_v61 = vadd.f32 %v3376_v56, %v876_v15  ;;  %v1296_v62 = vld [vmem:[%s4406_s3 + $0x2d0] sm:$0xff] }
 0x2ab   :  { %767 = vrot.lane.b32.xlu1 %v3881_v7, %s2746_s0  ;;  %v515_v39 = vpop.permute.xlu1 %514  ;;  %v1067_v8 = vpop.permute.xlu0 %1066  ;;  %2594 = vmatprep.subr.bf16.mxu1 %v2593_v28  ;;  %v2607_v28 = vpack.c.bf16 %v1279_v33, %v1278_v11  ;;  %v2609_v20 = vpack.c.bf16 %v1297_v30, %v1296_v62  ;;  %v1323_v11 = vld [vmem:[%s4406_s3 + $0x3a8] sm:$0xff] }
 0x2ac   :  { %v963_v17 = vmax.f32 %v914_v27, 0.0  ;;  %v3898_v63 = vmax.f32 %v3219_v25, %v515_v39  ;;  %v981_v18 = vmax.f32 %v932_v61, 0.0  ;;  %v2611_v39 = vpack.c.bf16 %v1281_v58, %v1280_v48  ;;  %v1303_v61 = vld [vmem:[%s4406_s3 + $0x308] sm:$0xff] }
 0x2ad   :  { %v1327_v48 = vld [vmem:[%s4406_s3 + $0x3c8] sm:$0xff] }
 0x2ae   :  { %1064 = vst.msk [vmem:[#allocation2 + $0x20] sm:$0xff] %vm996_vm1, %v963_v17  ;;  %759 = vrot.lane.b32.xlu0 %v3898_v63, %s2746_s0  ;;  %2596 = vmatpush3.bf16.msra.mxu1 %v2595_v0  ;;  %v1301_v17 = vld [vmem:[%s4406_s3 + $0x2f8] sm:$0xff] }
 0x2af   :  { %1069 = vst.msk [vmem:[#allocation2 + $0x20] sm:$0xff] %vm1002_vm2, %v1067_v8  ;;  %1146 = vrot.lane.b32.xlu1 %v984_v59, %s2747_s22  ;;  %v772_v25 = vpop.permute.xlu1 %771  ;;  %v1072_v47 = vpop.permute.xlu0 %1071  ;;  %2598 = vmatprep.subr.bf16.mxu1 %v2597_v36  ;;  %v2617_v3 = vpack.c.bf16 %v1301_v17, %v1300_v4  ;;  %v1285_v59 = vld [vmem:[%s4406_s3 + $0x278] sm:$0xff]  ;;  %v1331_v4 = vld [vmem:[%s4406_s3 + $0x3e8] sm:$0xff] }
 0x2b0   :  { %v880_v1 = vmax.f32 %v3636_v14, %v772_v25  ;;  %1074 = vst.msk [vmem:[#allocation2 + $0x20] sm:$0xff] %vm1008_vm3, %v1072_v47  ;;  %v1319_v25 = vld [vmem:[%s4406_s3 + $0x388] sm:$0xff] }
 0x2b2   :  { %v936_v29 = vadd.f32 %v3376_v56, %v880_v1  ;;  %1130 = vrot.lane.b32.xlu0 %v980_v37, %s2747_s22  ;;  %2600 = vmatpush3.bf16.msra.mxu1 %v2599_v38  ;;  %v1318_v38 = vld [vmem:[%s4406_s3 + $0x380] sm:$0xff] }
 0x2b3   :  { %v774_v14 = vpop.permute.xlu1 %773  ;;  %v766_v13 = vpop.permute.xlu0 %765  ;;  %2602 = vmatprep.subr.bf16.mxu1 %v2601_v46  ;;  %v2619_v46 = vpack.c.bf16 %v1285_v59, %v1284_v42  ;;  %v2621_v21 = vpack.c.bf16 %v1319_v25, %v1318_v38  ;;  %v1302_v37 = vld [vmem:[%s4406_s3 + $0x300] sm:$0xff]  ;;  %v1332_v42 = vld [vmem:[%s4406_s3 + $0x3f0] sm:$0xff]  ;;  %v1333_v59 = vld [vmem:[%s4406_s3 + $0x3f8] sm:$0xff] }
 0x2b4   :  { %v985_v44 = vmax.f32 %v936_v29, 0.0  ;;  %v881_v12 = vmax.f32 %v3648_v5, %v774_v14  ;;  %v877_v41 = vmax.f32 %v3644_v40, %v766_v13  ;;  %v2623_v14 = vpack.c.bf16 %v1303_v61, %v1302_v37  ;;  %v4012_v13 = vld [vmem:[%s4405_s2] ss:$0 sm:$0xff]  ;;  %v1351_v37 = vld [vmem:[%s4406_s3 + $0x488] sm:$0xff] }
 0x2b5   :  { %v2649_v25 = vpack.c.bf16 %v1333_v59, %v1332_v42 }
 0x2b6   :  { %v937_v5 = vadd.f32 %v3376_v56, %v881_v12  ;;  %v933_v40 = vadd.f32 %v3376_v56, %v877_v41  ;;  %1151 = vrot.lane.b32.xlu1 %v985_v44, %s2746_s0  ;;  %1135 = vrot.lane.b32.xlu0 %v981_v18, %s2746_s0  ;;  %v1304_v18 = vld [vmem:[%s4406_s3 + $0x310] sm:$0xff]  ;;  %v1305_v44 = vld [vmem:[%s4406_s3 + $0x318] sm:$0xff] }
 0x2b7   :  { %v1083_v22 = vpop.permute.xlu1 %1082  ;;  %v752_v34 = vpop.permute.xlu0 %751  ;;  %2604 = vmatpush3.bf16.msra.mxu1 %v2603_v51  ;;  %v1322_v41 = vld [vmem:[%s4406_s3 + $0x3a0] sm:$0xff]  ;;  %v2627_v30 = vpack.c.bf16 %v1305_v44, %v1304_v18 }
 0x2b8   :  { %v986_v43 = vmax.f32 %v937_v5, 0.0  ;;  %v982_v23 = vmax.f32 %v933_v40, 0.0  ;;  %1085 = vst.msk [vmem:[#allocation2 + $0x28] sm:$0xff] %vm1002_vm2, %v1083_v22  ;;  %v870_v19 = vmax.f32 %v3657_v45, %v752_v34  ;;  %2606 = vmatprep.subr.bf16.mxu1 %v2605_v35  ;;  %v2625_v35 = vpack.c.bf16 %v1321_v60, %v1320_v10  ;;  %v1306_v40 = vld [vmem:[%s4406_s3 + $0x320] sm:$0xff]  ;;  %v1307_v22 = vld [vmem:[%s4406_s3 + $0x328] sm:$0xff]  ;;  %v1325_v34 = vld [vmem:[%s4406_s3 + $0x3b8] sm:$0xff] }
 0x2b9   :  { %v2629_v5 = vpack.c.bf16 %v1323_v11, %v1322_v41 }
 0x2ba   :  { %v926_v45 = vadd.f32 %v3376_v56, %v870_v19  ;;  %1156 = vrot.lane.b32.xlu1 %v986_v43, %s2745_s10  ;;  %1140 = vrot.lane.b32.xlu0 %v982_v23, %s2745_s10  ;;  %v1282_v56 = vld [vmem:[%s4406_s3 + $0x260] sm:$0xff]  ;;  %v1308_v23 = vld [vmem:[%s4406_s3 + $0x330] sm:$0xff] }
 0x2bb   :  { %v1088_v27 = vpop.permute.xlu1 %1087  ;;  %v539_v0 = vpop.permute.xlu0 %538  ;;  %2608 = vmatpush3.bf16.msra.mxu1 %v2607_v28  ;;  %v2615_v15 = vpack.c.bf16 %v1283_v57, %v1282_v56  ;;  %v2631_v28 = vpack.c.bf16 %v1307_v22, %v1306_v40  ;;  %v1309_v19 = vld [vmem:[%s4406_s3 + $0x338] sm:$0xff]  ;;  %v1330_v57 = vld [vmem:[%s4406_s3 + $0x3e0] sm:$0xff] }
 0x2bc   :  { %v975_v8 = vmax.f32 %v926_v45, 0.0  ;;  %1090 = vst.msk [vmem:[#allocation2 + $0x28] sm:$0xff] %vm1008_vm3, %v1088_v27  ;;  %v3965_v36 = vmax.f32 %v3315_v26, %v539_v0  ;;  %2610 = vmatprep.subr.bf16.mxu1 %v2609_v20  ;;  %v1326_v20 = vld [vmem:[%s4406_s3 + $0x3c0] sm:$0xff]  ;;  %v2635_v58 = vpack.c.bf16 %v1309_v19, %v1308_v23  ;;  %v1311_v45 = vld [vmem:[%s4406_s3 + $0x348] sm:$0xff]  ;;  %v1328_v27 = vld [vmem:[%s4406_s3 + $0x3d0] sm:$0xff] }
 0x2bd   :  { %v2637_v54 = vpack.c.bf16 %v1327_v48, %v1326_v20  ;;  %v1329_v0 = vld [vmem:[%s4406_s3 + $0x3d8] sm:$0xff]  ;;  %v1334_v48 = vld [vmem:[%s4406_s3 + $0x400] sm:$0xff] }
 0x2be   :  { %1112 = vst.msk [vmem:[#allocation2 + $0x38] sm:$0xff] %vm996_vm1, %v975_v8  ;;  %783 = vrot.lane.b32.xlu1 %v3965_v36, %s2746_s0  ;;  %v2641_v8 = vpack.c.bf16 %v1329_v0, %v1328_v27  ;;  %v1313_v56 = vld [vmem:[%s4406_s3 + $0x358] sm:$0xff] }
 0x2bf   :  { %v1093_v26 = vpop.permute.xlu1 %1092  ;;  %2612 = vmatpush3.bf16.msra.mxu1 %v2611_v39  ;;  %v2639_v39 = vpack.c.bf16 %v1311_v45, %v1310_v50  ;;  %v1353_v0 = vld [vmem:[%s4406_s3 + $0x498] sm:$0xff] }
 0x2c0   :  { %1095 = vst.msk [vmem:[#allocation2 + $0x28] sm:$0xff] %vm1014_vm4, %v1093_v26  ;;  %2614 = vmatprep.subr.bf16.mxu1 %v2613_v53  ;;  %v1312_v53 = vld [vmem:[%s4406_s3 + $0x350] sm:$0xff]  ;;  %v2645_v26 = vpack.c.bf16 %v1331_v4, %v1330_v57  ;;  %v1337_v4 = vld [vmem:[%s4406_s3 + $0x418] sm:$0xff] }
 0x2c1   :  { %v2643_v17 = vpack.c.bf16 %v1313_v56, %v1312_v53  ;;  %v1336_v57 = vld [vmem:[%s4406_s3 + $0x410] sm:$0xff] }
 0x2c2   :  { %v2659_v59 = vpack.c.bf16 %v1337_v4, %v1336_v57  ;;  %v1385_v57 = vld [vmem:[%s4406_s3 + $0x598] sm:$0xff] }
 0x2c3   :  { %v1077_v47 = vpop.permute.xlu1 %1076  ;;  %2616 = vmatpush3.bf16.msra.mxu1 %v2615_v15  ;;  %v1314_v15 = vld [vmem:[%s4406_s3 + $0x360] sm:$0xff] }
 0x2c4   :  { %1079 = vst.msk [vmem:[#allocation2 + $0x20] sm:$0xff] %vm1014_vm4, %v1077_v47  ;;  %2618 = vmatprep.subr.bf16.mxu1 %v2617_v3  ;;  %v1315_v3 = vld [vmem:[%s4406_s3 + $0x368] sm:$0xff]  ;;  %v1316_v47 = vld [vmem:[%s4406_s3 + $0x370] sm:$0xff] }
 0x2c5   :  { %v2647_v38 = vpack.c.bf16 %v1315_v3, %v1314_v15  ;;  %v1355_v15 = vld [vmem:[%s4406_s3 + $0x4a8] sm:$0xff] }
 0x2c7   :  { %v744_v1 = vpop.permute.xlu1 %743  ;;  %v1198_v24 = vld [vmem:[#allocation2 + $0x28] sm:$0xff]  ;;  %2620 = vmatpush3.bf16.msra.mxu1 %v2619_v46  ;;  %v1317_v46 = vld [vmem:[%s4406_s3 + $0x378] sm:$0xff] }
 0x2c8   :  { %v866_v29 = vmax.f32 %v3673_v2, %v744_v1  ;;  %1616 = vmatprep.mubr.f32.mxu1 %v1198_v24  ;;  %2622 = vmatprep.subr.bf16.mxu1 %v2621_v21  ;;  %v1350_v21 = vld [vmem:[%s4406_s3 + $0x480] sm:$0xff]  ;;  %v2651_v61 = vpack.c.bf16 %v1317_v46, %v1316_v47  ;;  %v1339_v46 = vld [vmem:[%s4406_s3 + $0x428] sm:$0xff] }
 0x2c9   :  { %v2653_v1 = vpack.c.bf16 %v1351_v37, %v1350_v21  ;;  %v1338_v47 = vld [vmem:[%s4406_s3 + $0x420] sm:$0xff]  ;;  %v1356_v37 = vld [vmem:[%s4406_s3 + $0x4b0] sm:$0xff] }
 0x2ca   :  { %v922_v51 = vadd.f32 %v4012_v13, %v866_v29 }
 0x2cb   :  { %v531_v2 = vpop.permute.xlu1 %530  ;;  %v1197_v12 = vld [vmem:[#allocation2 + $0x20] sm:$0xff] }
 0x2cc   :  { %v971_v33 = vmax.f32 %v922_v51, 0.0  ;;  %v4028_v62 = vmax.f32 %v3273_v6, %v531_v2  ;;  %1617 = vmatmul.mubr.f32.vlgmr.msra.gmra.mrb[4].mxu1 %v1197_v12  ;;  %v1324_v6 = vld [vmem:[%s4406_s3 + $0x3b0] sm:$0xff] }
 0x2cd   :  { %2624 = vmatpush3.bf16.msra.mxu1 %v2623_v14  ;;  %v2633_v43 = vpack.c.bf16 %v1325_v34, %v1324_v6 }
 0x2ce   :  { %1096 = vst.msk [vmem:[#allocation2 + $0x30] sm:$0xff] %vm996_vm1, %v971_v33  ;;  %775 = vrot.lane.b32.xlu0 %v4028_v62, %s2746_s0  ;;  %2626 = vmatprep.subr.bf16.mxu1 %v2625_v35 }
 0x2d1   :  { %2628 = vmatpush3.bf16.msra.mxu1 %v2627_v30 }
 0x2d2   :  { %2630 = vmatprep.subr.bf16.mxu1 %v2629_v5 }
 0x2d5   :  { %2632 = vmatpush3.bf16.msra.mxu1 %v2631_v28 }
 0x2d6   :  { %2634 = vmatprep.subr.bf16.mxu1 %v2633_v43 }
 0x2d9   :  { %2636 = vmatpush3.bf16.msra.mxu1 %v2635_v58  ;;  %v1335_v58 = vld [vmem:[%s4406_s3 + $0x408] sm:$0xff] }
 0x2da   :  { %2638 = vmatprep.subr.bf16.mxu1 %v2637_v54 }
 0x2dd   :  { %2640 = vmatpush3.bf16.msra.mxu1 %v2639_v39 }
 0x2de   :  { %2642 = vmatprep.subr.bf16.mxu1 %v2641_v8  ;;  %v2655_v8 = vpack.c.bf16 %v1335_v58, %v1334_v48  ;;  %v1365_v48 = vld [vmem:[%s4406_s3 + $0x4f8] sm:$0xff] }
 0x2e1   :  { %2644 = vmatpush3.bf16.msra.mxu1 %v2643_v17 }
 0x2e2   :  { %2646 = vmatprep.subr.bf16.mxu1 %v2645_v26  ;;  %v1354_v26 = vld [vmem:[%s4406_s3 + $0x4a0] sm:$0xff] }
 0x2e5   :  { %2648 = vmatpush3.bf16.msra.mxu1 %v2647_v38 }
 0x2e6   :  { %2650 = vmatprep.subr.bf16.mxu1 %v2649_v25  ;;  %v2661_v25 = vpack.c.bf16 %v1355_v15, %v1354_v26  ;;  %v1368_v26 = vld [vmem:[%s4406_s3 + $0x510] sm:$0xff]  ;;  %v1369_v15 = vld [vmem:[%s4406_s3 + $0x518] sm:$0xff] }
 0x2e8   :  { %v786_v24 = vpop.permute.xlu0 %785 }
 0x2e9   :  { %v887_v10 = vmax.f32 %v3689_v55, %v786_v24  ;;  %2652 = vmatpush3.bf16.msra.mxu1 %v2651_v61  ;;  %v1357_v61 = vld [vmem:[%s4406_s3 + $0x4b8] sm:$0xff] }
 0x2ea   :  { %2654 = vmatprep.subr.bf16.mxu1 %v2653_v1  ;;  %v2663_v1 = vpack.c.bf16 %v1339_v46, %v1338_v47  ;;  %v1370_v46 = vld [vmem:[%s4406_s3 + $0x520] sm:$0xff] }
 0x2eb   :  { %v943_v60 = vadd.f32 %v4012_v13, %v887_v10 }
 0x2ec   :  { %v788_v29 = vpop.permute.xlu1 %787 }
 0x2ed   :  { %v992_v14 = vmax.f32 %v943_v60, 0.0  ;;  %v888_v51 = vmax.f32 %v3695_v31, %v788_v29  ;;  %v2665_v60 = vpack.c.bf16 %v1357_v61, %v1356_v37  ;;  %v1340_v29 = vld [vmem:[%s4406_s3 + $0x430] sm:$0xff]  ;;  %v1389_v61 = vld [vmem:[%s4406_s3 + $0x5b8] sm:$0xff] }
 0x2ee   :  { %v1388_v37 = vld [vmem:[%s4406_s3 + $0x5b0] sm:$0xff] }
 0x2ef   :  { %v944_v35 = vadd.f32 %v4012_v13, %v888_v51  ;;  %1178 = vrot.lane.b32.xlu1 %v992_v14, %s2747_s22  ;;  %v1341_v14 = vld [vmem:[%s4406_s3 + $0x438] sm:$0xff]  ;;  %v1358_v51 = vld [vmem:[%s4406_s3 + $0x4c0] sm:$0xff] }
 0x2f1   :  { %v993_v18 = vmax.f32 %v944_v35, 0.0  ;;  %v1359_v35 = vld [vmem:[%s4406_s3 + $0x4c8] sm:$0xff] }
 0x2f3   :  { %1183 = vrot.lane.b32.xlu1 %v993_v18, %s2746_s0  ;;  %v2667_v18 = vpack.c.bf16 %v1341_v14, %v1340_v29  ;;  %v1390_v29 = vld [vmem:[%s4406_s3 + $0x5c0] sm:$0xff]  ;;  %v1391_v14 = vld [vmem:[%s4406_s3 + $0x5c8] sm:$0xff] }
 0x300   :  { %v778_v44 = vpop.permute.xlu0 %777 }
 0x301   :  { %v883_v2 = vmax.f32 %v3737_v9, %v778_v44 }
 0x303   :  { %v939_v55 = vadd.f32 %v4012_v13, %v883_v2 }
 0x304   :  { %v780_v12 = vpop.permute.xlu0 %779 }
 0x305   :  { %v988_v41 = vmax.f32 %v939_v55, 0.0  ;;  %v884_v11 = vmax.f32 %v3758_v52, %v780_v12  ;;  %v2669_v55 = vpack.c.bf16 %v1359_v35, %v1358_v51  ;;  %v1342_v12 = vld [vmem:[%s4406_s3 + $0x440] sm:$0xff]  ;;  %v2701_v35 = vpack.c.bf16 %v1391_v14, %v1390_v29 }
 0x306   :  { %v1907_v14 = vld [vmem:[%s4408_s5 + $0x20] sm:$0xff] }
 0x307   :  { %v940_v33 = vadd.f32 %v4012_v13, %v884_v11  ;;  %1162 = vrot.lane.b32.xlu0 %v988_v41, %s2747_s22  ;;  %v1343_v41 = vld [vmem:[%s4406_s3 + $0x448] sm:$0xff]  ;;  %v1360_v11 = vld [vmem:[%s4406_s3 + $0x4d0] sm:$0xff] }
 0x308   :  { %v1099_v31 = vpop.permute.xlu0 %1098 }
 0x309   :  { %v989_v30 = vmax.f32 %v940_v33, 0.0  ;;  %v790_v5 = vpop.permute.xlu1 %789  ;;  %1101 = vst.msk [vmem:[#allocation2 + $0x30] sm:$0xff] %vm1002_vm2, %v1099_v31  ;;  %v1361_v33 = vld [vmem:[%s4406_s3 + $0x4d8] sm:$0xff]  ;;  %v2671_v31 = vpack.c.bf16 %v1343_v41, %v1342_v12 }
 0x30a   :  { %v889_v40 = vmax.f32 %v3780_v49, %v790_v5  ;;  %v2673_v5 = vpack.c.bf16 %v1361_v33, %v1360_v11  ;;  %v1376_v11 = vld [vmem:[%s4406_s3 + $0x550] sm:$0xff]  ;;  %v1377_v33 = vld [vmem:[%s4406_s3 + $0x558] sm:$0xff] }
 0x30b   :  { %1167 = vrot.lane.b32.xlu0 %v989_v30, %s2746_s0 }
 0x30c   :  { %v945_v9 = vadd.f32 %v4012_v13, %v889_v40  ;;  %v1104_v22 = vpop.permute.xlu0 %1103  ;;  %v1344_v40 = vld [vmem:[%s4406_s3 + $0x450] sm:$0xff] }
 0x30d   :  { %v1115_v6 = vpop.permute.xlu1 %1114  ;;  %1106 = vst.msk [vmem:[#allocation2 + $0x30] sm:$0xff] %vm1008_vm3, %v1104_v22 }
 0x30e   :  { %v994_v52 = vmax.f32 %v945_v9, 0.0  ;;  %1117 = vst.msk [vmem:[#allocation2 + $0x38] sm:$0xff] %vm1002_vm2, %v1115_v6  ;;  %v1345_v9 = vld [vmem:[%s4406_s3 + $0x458] sm:$0xff]  ;;  %v1362_v6 = vld [vmem:[%s4406_s3 + $0x4e0] sm:$0xff] }
 0x310   :  { %1188 = vrot.lane.b32.xlu1 %v994_v52, %s2745_s10  ;;  %v1363_v52 = vld [vmem:[%s4406_s3 + $0x4e8] sm:$0xff] }
 0x311   :  { %v1120_v34 = vpop.permute.xlu1 %1119 }
 0x312   :  { %1122 = vst.msk [vmem:[#allocation2 + $0x38] sm:$0xff] %vm1008_vm3, %v1120_v34 }
 0x315   :  { %v1125_v28 = vpop.permute.xlu1 %1124 }
 0x316   :  { %1127 = vst.msk [vmem:[#allocation2 + $0x38] sm:$0xff] %vm1014_vm4, %v1125_v28  ;;  %v2675_v28 = vpack.c.bf16 %v1345_v9, %v1344_v40  ;;  %v1378_v9 = vld [vmem:[%s4406_s3 + $0x560] sm:$0xff] }
 0x318   :  { %v782_v49 = vpop.permute.xlu0 %781 }
 0x319   :  { %v1109_v43 = vpop.permute.xlu1 %1108  ;;  %v885_v23 = vmax.f32 %v3854_v16, %v782_v49  ;;  %v1352_v16 = vld [vmem:[%s4406_s3 + $0x490] sm:$0xff] }
 0x31a   :  { %1111 = vst.msk [vmem:[#allocation2 + $0x30] sm:$0xff] %vm1014_vm4, %v1109_v43  ;;  %v2657_v56 = vpack.c.bf16 %v1353_v0, %v1352_v16  ;;  %v2677_v43 = vpack.c.bf16 %v1363_v52, %v1362_v6  ;;  %v1382_v16 = vld [vmem:[%s4406_s3 + $0x580] sm:$0xff]  ;;  %v1383_v0 = vld [vmem:[%s4406_s3 + $0x588] sm:$0xff]  ;;  %v1396_v6 = vld [vmem:[%s4406_s3 + $0x5f0] sm:$0xff] }
 0x31b   :  { %v941_v19 = vadd.f32 %v4012_v13, %v885_v23  ;;  %v1346_v23 = vld [vmem:[%s4406_s3 + $0x460] sm:$0xff]  ;;  %v1397_v52 = vld [vmem:[%s4406_s3 + $0x5f8] sm:$0xff] }
 0x31c   :  { %v547_v20 = vpop.permute.xlu0 %546 }
 0x31d   :  { %v990_v54 = vmax.f32 %v941_v19, 0.0  ;;  %v768_v50 = vpop.permute.xlu1 %767  ;;  %v4135_v45 = vmax.f32 %v3598_v32, %v547_v20  ;;  %v1200_v27 = vld [vmem:[#allocation2 + $0x38] sm:$0xff]  ;;  %v1364_v20 = vld [vmem:[%s4406_s3 + $0x4f0] sm:$0xff] }
 0x31e   :  { %v878_v39 = vmax.f32 %v3881_v7, %v768_v50  ;;  %1686 = vmatprep.mubr.f32.mxu1 %v1200_v27  ;;  %v1348_v50 = vld [vmem:[%s4406_s3 + $0x470] sm:$0xff]  ;;  %v1349_v27 = vld [vmem:[%s4406_s3 + $0x478] sm:$0xff] }
 0x31f   :  { %1172 = vrot.lane.b32.xlu0 %v990_v54, %s2745_s10  ;;  %791 = vrot.lane.b32.xlu1 %v4135_v45, %s2746_s0  ;;  %v2681_v54 = vpack.c.bf16 %v1365_v48, %v1364_v20  ;;  %v4418_v48 = vmov 0.0|0.0  }
 0x320   :  { %v934_v32 = vadd.f32 %v4012_v13, %v878_v39  ;;  %v760_v53 = vpop.permute.xlu0 %759  ;;  %v2683_v39 = vpack.c.bf16 %v1349_v27, %v1348_v50  ;;  %v1999_v27 = vld [vmem:[%s4407_s4] ss:$0 sm:$0xff] }
 0x321   :  { %v874_v7 = vmax.f32 %v3898_v63, %v760_v53  ;;  %v1199_v17 = vld [vmem:[#allocation2 + $0x30] sm:$0xff]  ;;  %v1147_v38 = vpop.permute.xlu1 %1146  ;;  %v1367_v53 = vld [vmem:[%s4406_s3 + $0x508] sm:$0xff] }
 0x322   :  { %v983_v3 = vmax.f32 %v934_v32, 0.0  ;;  %1687 = vmatmul.mubr.f32.vlgmr.msra.gmra.mrb[6].mxu1 %v1199_v17  ;;  %v1366_v32 = vld [vmem:[%s4406_s3 + $0x500] sm:$0xff] }
 0x323   :  { %v930_v42 = vadd.f32 %v4012_v13, %v874_v7  ;;  %2656 = vmatpush3.bf16.msra.mxu1 %v2655_v8  ;;  %v2685_v8 = vpack.c.bf16 %v1383_v0, %v1382_v16  ;;  %v2687_v4 = vpack.c.bf16 %v1367_v53, %v1366_v32 }
 0x324   :  { %1144 = vst.msk [vmem:[#allocation2 + $0x48] sm:$0xff] %vm996_vm1, %v983_v3  ;;  %2658 = vmatprep.subr.bf16.mxu1 %v2657_v56  ;;  %v1131_v63 = vpop.permute.xlu0 %1130  ;;  %v1384_v56 = vld [vmem:[%s4406_s3 + $0x590] sm:$0xff] }
 0x325   :  { %1149 = vst.msk [vmem:[#allocation2 + $0x48] sm:$0xff] %vm1002_vm2, %v1147_v38  ;;  %v979_v21 = vmax.f32 %v930_v42, 0.0  ;;  %v2689_v17 = vpack.c.bf16 %v1385_v57, %v1384_v56  ;;  %v1387_v38 = vld [vmem:[%s4406_s3 + $0x5a8] sm:$0xff] }
 0x327   :  { %1128 = vst.msk [vmem:[#allocation2 + $0x40] sm:$0xff] %vm996_vm1, %v979_v21  ;;  %2660 = vmatpush3.bf16.msra.mxu1 %v2659_v59  ;;  %v1386_v59 = vld [vmem:[%s4406_s3 + $0x5a0] sm:$0xff] }
 0x328   :  { %1133 = vst.msk [vmem:[#allocation2 + $0x40] sm:$0xff] %vm1002_vm2, %v1131_v63  ;;  %v1152_v24 = vpop.permute.xlu1 %1151  ;;  %2662 = vmatprep.subr.bf16.mxu1 %v2661_v25  ;;  %v1136_v10 = vpop.permute.xlu0 %1135  ;;  %v2691_v25 = vpack.c.bf16 %v1369_v15, %v1368_v26  ;;  %v2693_v47 = vpack.c.bf16 %v1387_v38, %v1386_v59  ;;  %v1398_v15 = vld [vmem:[%s4406_s3 + $0x600] sm:$0xff] }
 0x329   :  { %1154 = vst.msk [vmem:[#allocation2 + $0x48] sm:$0xff] %vm1008_vm3, %v1152_v24  ;;  %1138 = vst.msk [vmem:[#allocation2 + $0x40] sm:$0xff] %vm1008_vm3, %v1136_v10  ;;  %v2697_v24 = vpack.c.bf16 %v1389_v61, %v1388_v37  ;;  %v1372_v10 = vld [vmem:[%s4406_s3 + $0x530] sm:$0xff] }
 0x32b   :  { %2664 = vmatpush3.bf16.msra.mxu1 %v2663_v1 }
 0x32c   :  { %v1157_v44 = vpop.permute.xlu1 %1156  ;;  %2666 = vmatprep.subr.bf16.mxu1 %v2665_v60  ;;  %v1141_v2 = vpop.permute.xlu0 %1140  ;;  %v1373_v60 = vld [vmem:[%s4406_s3 + $0x538] sm:$0xff] }
 0x32d   :  { %1159 = vst.msk [vmem:[#allocation2 + $0x48] sm:$0xff] %vm1014_vm4, %v1157_v44  ;;  %1143 = vst.msk [vmem:[#allocation2 + $0x40] sm:$0xff] %vm1014_vm4, %v1141_v2  ;;  %v2699_v51 = vpack.c.bf16 %v1373_v60, %v1372_v10  ;;  %v1375_v44 = vld [vmem:[%s4406_s3 + $0x548] sm:$0xff]  ;;  %v1392_v2 = vld [vmem:[%s4406_s3 + $0x5d0] sm:$0xff] }
 0x32e   :  { %v1905_v10 = vld [vmem:[%s4408_s5 + $0x10] sm:$0xff]  ;;  %v1906_v60 = vld [vmem:[%s4408_s5 + $0x18] sm:$0xff] }
 0x32f   :  { %2668 = vmatpush3.bf16.msra.mxu1 %v2667_v18  ;;  %v1374_v18 = vld [vmem:[%s4406_s3 + $0x540] sm:$0xff]  ;;  %v2727_v29 = vpack.c.bf16 %v1906_v60, %v1905_v10 }
 0x330   :  { %v784_v30 = vpop.permute.xlu1 %783  ;;  %2670 = vmatprep.subr.bf16.mxu1 %v2669_v55  ;;  %v1393_v55 = vld [vmem:[%s4406_s3 + $0x5d8] sm:$0xff]  ;;  %v2703_v12 = vpack.c.bf16 %v1375_v44, %v1374_v18  ;;  %v1909_v44 = vld [vmem:[%s4408_s5 + $0x30] sm:$0xff] }
 0x331   :  { %v886_v22 = vmax.f32 %v3965_v36, %v784_v30  ;;  %v1347_v36 = vld [vmem:[%s4406_s3 + $0x468] sm:$0xff]  ;;  %v2705_v41 = vpack.c.bf16 %v1393_v55, %v1392_v2  ;;  %v1910_v2 = vld [vmem:[%s4408_s5 + $0x38] sm:$0xff] }
 0x332   :  { %v2679_v58 = vpack.c.bf16 %v1347_v36, %v1346_v23  ;;  %v1395_v30 = vld [vmem:[%s4406_s3 + $0x5e8] sm:$0xff] }
 0x333   :  { %v942_v34 = vadd.f32 %v4012_v13, %v886_v22  ;;  %2672 = vmatpush3.bf16.msra.mxu1 %v2671_v31  ;;  %v1394_v31 = vld [vmem:[%s4406_s3 + $0x5e0] sm:$0xff]  ;;  %v1379_v22 = vld [vmem:[%s4406_s3 + $0x568] sm:$0xff] }
 0x334   :  { %2674 = vmatprep.subr.bf16.mxu1 %v2673_v5  ;;  %v1202_v49 = vld [vmem:[#allocation2 + $0x48] sm:$0xff]  ;;  %v1201_v3 = vld [vmem:[#allocation2 + $0x40] sm:$0xff]  ;;  %v2707_v5 = vpack.c.bf16 %v1377_v33, %v1376_v11  ;;  %v2709_v40 = vpack.c.bf16 %v1395_v30, %v1394_v31 }
 0x335   :  { %v991_v19 = vmax.f32 %v942_v34, 0.0  ;;  %1756 = vmatprep.mubr.f32.mxu1 %v1202_v49  ;;  %v2711_v34 = vpack.c.bf16 %v1379_v22, %v1378_v9  ;;  %v1380_v49 = vld [vmem:[%s4406_s3 + $0x570] sm:$0xff] }
 0x337   :  { %1176 = vst.msk [vmem:[#allocation2 + $0x58] sm:$0xff] %vm996_vm1, %v991_v19  ;;  %2676 = vmatpush3.bf16.msra.mxu1 %v2675_v28  ;;  %v2713_v28 = vpack.c.bf16 %v1397_v52, %v1396_v6 }
 0x338   :  { %2678 = vmatprep.subr.bf16.mxu1 %v2677_v43  ;;  %v1381_v43 = vld [vmem:[%s4406_s3 + $0x578] sm:$0xff] }
 0x339   :  { %v2715_v23 = vpack.c.bf16 %v1381_v43, %v1380_v49  ;;  %v2001_v43 = vld [vmem:[%s4409_s6] ss:$0 sm:$0xff] }
 0x33b   :  { %2680 = vmatpush3.bf16.msra.mxu1 %v2679_v58 }
 0x33c   :  { %2682 = vmatprep.subr.bf16.mxu1 %v2681_v54 }
 0x33f   :  { %2684 = vmatpush3.bf16.msra.mxu1 %v2683_v39 }
 0x340   :  { %v776_v7 = vpop.permute.xlu0 %775  ;;  %2686 = vmatprep.subr.bf16.mxu1 %v2685_v8 }
 0x341   :  { %v882_v42 = vmax.f32 %v4028_v62, %v776_v7  ;;  %v1371_v62 = vld [vmem:[%s4406_s3 + $0x528] sm:$0xff] }
 0x342   :  { %1757 = vmatmul.mubr.f32.vlgmr.msra.gmra.mrb[8].mxu1 %v1201_v3  ;;  %v2695_v1 = vpack.c.bf16 %v1371_v62, %v1370_v46  ;;  %v1399_v3 = vld [vmem:[%s4406_s3 + $0x608] sm:$0xff] }
 0x343   :  { %v938_v63 = vadd.f32 %v4012_v13, %v882_v42  ;;  %2688 = vmatpush3.bf16.msra.mxu1 %v2687_v4  ;;  %v2718_v59 = vpack.c.bf16 %v1399_v3, %v1398_v15  ;;  %v1904_v46 = vld [vmem:[%s4408_s5 + $0x8] sm:$0xff] }
 0x344   :  { %2690 = vmatprep.subr.bf16.mxu1 %v2689_v17 }
 0x345   :  { %v987_v21 = vmax.f32 %v938_v63, 0.0 }
 0x347   :  { %1160 = vst.msk [vmem:[#allocation2 + $0x50] sm:$0xff] %vm996_vm1, %v987_v21  ;;  %2692 = vmatpush3.bf16.msra.mxu1 %v2691_v25  ;;  %v4419_v25 = vmov 0.0  }
 0x348   :  { %2694 = vmatprep.subr.bf16.mxu1 %v2693_v47  ;;  %v1903_v47 = vld [vmem:[%s4408_s5] sm:$0xff] }
 0x349   :  { %v2724_v37 = vpack.c.bf16 %v1904_v46, %v1903_v47 }
 0x34b   :  { %2696 = vmatpush3.bf16.msra.mxu1 %v2695_v1 }
 0x34c   :  { %2698 = vmatprep.subr.bf16.mxu1 %v2697_v24 }
 0x34f   :  { %2700 = vmatpush3.bf16.msra.mxu1 %v2699_v51  ;;  %v1908_v51 = vld [vmem:[%s4408_s5 + $0x28] sm:$0xff] }
 0x350   :  { %2702 = vmatprep.subr.bf16.mxu1 %v2701_v35  ;;  %v2730_v35 = vpack.c.bf16 %v1908_v51, %v1907_v14 }
 0x353   :  { %2704 = vmatpush3.bf16.msra.mxu1 %v2703_v12  ;;  %v2733_v12 = vpack.c.bf16 %v1910_v2, %v1909_v44 }
 0x354   :  { %2706 = vmatprep.subr.bf16.mxu1 %v2705_v41 }
 0x357   :  { %2708 = vmatpush3.bf16.msra.mxu1 %v2707_v5 }
 0x358   :  { %2710 = vmatprep.subr.bf16.mxu1 %v2709_v40 }
 0x35b   :  { %2712 = vmatpush3.bf16.msra.mxu1 %v2711_v34 }
 0x35c   :  { %v2100_v36 = vpop.f32.mrb[0].mxu1  ;;  %2714 = vmatprep.subr.bf16.mxu1 %v2713_v28 }
 0x35d   :  { %v2101_v19 = vpop.f32.mrb[1].mxu1 }
 0x35e   :  { %v2102_v20 = vadd.f32 %v2101_v19, %v2100_v36 }
 0x35f   :  { %2716 = vmatpush3.bf16.msra.mxu1 %v2715_v23 }
 0x360   :  { %2717 = vmatprep.subr.bf16.mxu1 %v4418_v48  ;;  %v1479_v8 = vadd.f32 %v2102_v20, %v1999_v27 }
 0x361   :  { %v1179_v58 = vpop.permute.xlu1 %1178 }
 0x362   :  { %1181 = vst.msk [vmem:[#allocation2 + $0x58] sm:$0xff] %vm1002_vm2, %v1179_v58 }
 0x365   :  { %v1184_v54 = vpop.permute.xlu1 %1183 }
 0x366   :  { %1186 = vst.msk [vmem:[#allocation2 + $0x58] sm:$0xff] %vm1008_vm3, %v1184_v54 }
 0x379   :  { %v1163_v50 = vpop.permute.xlu0 %1162 }
 0x37a   :  { %1165 = vst.msk [vmem:[#allocation2 + $0x50] sm:$0xff] %vm1002_vm2, %v1163_v50 }
 0x37c   :  { %v2135_v16 = vpop.f32.mrb[2].mxu1 }
 0x37d   :  { %v2136_v0 = vpop.f32.mrb[3].mxu1  ;;  %v1168_v39 = vpop.permute.xlu0 %1167 }
 0x37e   :  { %v2137_v32 = vadd.f32 %v2136_v0, %v2135_v16  ;;  %1170 = vst.msk [vmem:[#allocation2 + $0x50] sm:$0xff] %vm1008_vm3, %v1168_v39 }
 0x380   :  { %v1549_v53 = vadd.f32 %v2137_v32, %v1479_v8 }
 0x382   :  { %v1189_v56 = vpop.permute.xlu1 %1188 }
 0x383   :  { %1191 = vst.msk [vmem:[#allocation2 + $0x58] sm:$0xff] %vm1014_vm4, %v1189_v56 }
 0x38a   :  { %v1204_v57 = vld [vmem:[#allocation2 + $0x58] sm:$0xff] }
 0x38b   :  { %1826 = vmatprep.mubr.f32.mxu1 %v1204_v57 }
 0x391   :  { %v792_v4 = vpop.permute.xlu1 %791  ;;  %v1173_v7 = vpop.permute.xlu0 %1172 }
 0x392   :  { %v890_v17 = vmax.f32 %v4135_v45, %v792_v4  ;;  %1175 = vst.msk [vmem:[#allocation2 + $0x50] sm:$0xff] %vm1014_vm4, %v1173_v7  ;;  %v1400_v45 = vld [vmem:[%s4406_s3 + $0x610] sm:$0xff] }
 0x394   :  { %v946_v26 = vadd.f32 %v4012_v13, %v890_v17  ;;  %v1401_v13 = vld [vmem:[%s4406_s3 + $0x618] sm:$0xff] }
 0x395   :  { %v2721_v63 = vpack.c.bf16 %v1401_v13, %v1400_v45 }
 0x396   :  { %v995_v42 = vmax.f32 %v946_v26, 0.0 }
 0x398   :  { %1192 = vst.msk [vmem:[#allocation2 + $0x60] sm:$0xff] %vm996_vm1, %v995_v42 }
 0x399   :  { %v1203_v38 = vld [vmem:[#allocation2 + $0x50] sm:$0xff] }
 0x39a   :  { %1827 = vmatmul.mubr.f32.vlgmr.msra.gmra.mrb[10].mxu1 %v1203_v38 }
 0x39b   :  { %2719 = vmatpush3.bf16.msra.mxu1 %v2718_v59  ;;  %2479 = vmatprep.mubr.msk.f32.mxu1 %vm2743_vm0, %v4419_v25 }
 0x39c   :  { %2720 = vmatprep.subr.bf16.mxu1 %v4418_v48 }
 0x39f   :  { %2722 = vmatpush3.bf16.msra.mxu1 %v2721_v63  ;;  %v2170_v62 = vpop.f32.mrb[4].mxu1  ;;  %v1205_v21 = vld [vmem:[#allocation2 + $0x60] sm:$0xff] }
 0x3a0   :  { %v2171_v61 = vpop.f32.mrb[5].mxu1  ;;  %2723 = vmatprep.subr.bf16.mxu1 %v4418_v48 }
 0x3a1   :  { %v2172_v1 = vadd.f32 %v2171_v61, %v2170_v62 }
 0x3a2   :  { %2480 = vmatmul.mubr.msk.f32.vlgmr.msra.gmra.mrb[12].mxu1 %vm996_vm1, %v1205_v21 }
 0x3a3   :  { %v1619_v24 = vadd.f32 %v2172_v1, %v1549_v53  ;;  %2725 = vmatpush3.bf16.msra.mxu1 %v2724_v37  ;;  %2498 = vmatprep.mubr.msk.f32.mxu1 %vm2743_vm0, %v4419_v25 }
 0x3a4   :  { %2726 = vmatprep.subr.bf16.mxu1 %v4418_v48 }
 0x3a7   :  { %2728 = vmatpush3.bf16.msra.mxu1 %v2727_v29 }
 0x3a8   :  { %2729 = vmatprep.subr.bf16.mxu1 %v4418_v48 }
 0x3ab   :  { %2731 = vmatpush3.bf16.msra.mxu1 %v2730_v35 }
 0x3ac   :  { %2732 = vmatprep.subr.bf16.mxu1 %v4418_v48 }
 0x3af   :  { %2734 = vmatpush3.bf16.msra.mxu1 %v2733_v12 }
 0x3f5   :  { %v2205_v18 = vpop.f32.mrb[6].mxu1 }
 0x3f6   :  { %v2206_v55 = vpop.f32.mrb[7].mxu1 }
 0x3f7   :  { %v2207_v41 = vadd.f32 %v2206_v55, %v2205_v18 }
 0x3f9   :  { %v1689_v11 = vadd.f32 %v2207_v41, %v1619_v24 }
 0x415   :  { %v2240_v33 = vpop.f32.mrb[8].mxu1 }
 0x416   :  { %v2241_v31 = vpop.f32.mrb[9].mxu1 }
 0x417   :  { %v2242_v30 = vadd.f32 %v2241_v31, %v2240_v33 }
 0x419   :  { %v1759_v5 = vadd.f32 %v2242_v30, %v1689_v11 }
 0x46d   :  { %v2275_v40 = vpop.f32.mrb[10].mxu1 }
 0x46e   :  { %v2276_v9 = vpop.f32.mrb[11].mxu1 }
 0x46f   :  { %v2277_v22 = vadd.f32 %v2276_v9, %v2275_v40 }
 0x471   :  { %v1829_v6 = vadd.f32 %v2277_v22, %v1759_v5 }
 0x475   :  { %v1898_v52 = vpop.f32.mrb[12].mxu1 }
 0x476   :  { %v1899_v34 = vadd.f32 %v1898_v52, %v1829_v6  ;;  %v2481_v28 = vpop.f32.mrb[13].mxu1 }
 0x478   :  { %v1902_v49 = vmax.f32 %v1899_v34, 0.0 }
 0x47a   :  { %2499 = vmatmul.mubr.msk.f32.vlgmr.msra.gmra.mrb[14].mxu1 %vm1918_vm5, %v1902_v49 }
 0x54d   :  { %v1988_v23 = vpop.f32.mrb[14].mxu1 }
 0x54e   :  { %v1989_v36 = vadd.f32 %v2001_v43, %v1988_v23  ;;  %v2500_v19 = vpop.f32.mrb[15].mxu1 }
 0x550   :  { %1993 = vst.msk [vmem:[%s4410_s7] sm:$0xff] %vm1992_vm6, %v1989_v36 }

</bundles_post_ra>
